<compile_context>
chip_gen: v7x
topology: tpu7x:2x2x1
jax: 0.10.0
libtpu: 0.0.40
codegen_flags: <defaults>
</compile_context>

<pallas_src>
import functools

import jax
import jax.numpy as jnp
import numpy as np
from jax import lax
from jax.experimental import pallas as pl
from jax.experimental.pallas import tpu as pltpu


def _round_up(x, m):
    return (x + m - 1) // m * m


def _vmem_capacity_bytes():
    try:
        info = pltpu.get_tpu_info()
        for attr in ("vmem_capacity_bytes", "vmem_size_bytes", "vmem_bytes"):
            v = getattr(info, attr, None)
            if v:
                return int(v)
    except Exception:
        pass
    return 64 << 20   # conservative default (v7x per-TensorCore VMEM)


# ---------------------------------------------------------------------------
# Fused kernel: all (odd-K) conv branches share one conv1 / one conv2 matmul
# ---------------------------------------------------------------------------
def _fused_odd_kernel(Kmax, Wa, W_real, D, Co, n_br, *refs):
    """refs:
        x_ref                       (B, Wa + 2*pad_max, 2*D)
        w1c, b1c, w2c, b2c          (Kmax*2D, n_br*D), (1, n_br*D),
                                    (Kmax*n_br*D, n_br*Co), (1, n_br*Co)
        fc1_w, fc1_b, fc2_w, fc2_b  (F, F//2), (1, F//2), (F//2, Cp), (1, Cp)
        o_ref                       (B, Cp)
    """
    (x_ref, w1_ref, b1_ref, w2_ref, b2_ref,
     fc1_w_ref, fc1_b_ref, fc2_w_ref, fc2_b_ref, o_ref) = refs

    x = x_ref[...]                              # compute dtype (bf16 or f32)
    B = x.shape[0]
    cdt = x.dtype
    twoD = 2 * D
    nD = n_br * D
    nCo = n_br * Co
    pad_max = Kmax // 2

    # ---- conv1: all branches as ONE matmul (block-diagonal combined weight) ----
    w1 = w1_ref[...]
    if twoD >= 128:
        # accumulate over taps: avoids K copies of the activation in VMEM
        acc = None
        for t in range(Kmax):
            xt = x[:, t:t + Wa, :].reshape(B * Wa, twoD)
            p = jnp.dot(xt, w1[t * twoD:(t + 1) * twoD, :],
                        preferred_element_type=jnp.float32)
            acc = p if acc is None else acc + p
        h1 = acc + b1_ref[...]
    else:
        xu = jnp.concatenate([x[:, t:t + Wa, :] for t in range(Kmax)],
                             axis=-1).reshape(B * Wa, Kmax * twoD)
        h1 = jnp.dot(xu, w1, preferred_element_type=jnp.float32) + b1_ref[...]
    # ReLU in f32 (VPU math stays f32 -> v5e-safe), then cast BEFORE pad/unfold
    h1 = jnp.maximum(h1, 0.0).reshape(B, Wa, nD).astype(cdt)

    # Drop the alignment rows (>= W_real) and re-insert the conv2 zero padding
    # explicitly (front: pad_max, back: pad_max + (Wa - W_real)); per-branch
    # offsets are baked into the combined conv2 weight.
    front = jnp.zeros((B, pad_max, nD), cdt)
    back = jnp.zeros((B, pad_max + (Wa - W_real), nD), cdt)
    h1p = jnp.concatenate([front, h1[:, :W_real, :], back], axis=1)

    # ---- conv2: all branches as ONE matmul ----
    w2 = w2_ref[...]
    if nD >= 128:
        acc = None
        for t in range(Kmax):
            ht = h1p[:, t:t + Wa, :].reshape(B * Wa, nD)
            p = jnp.dot(ht, w2[t * nD:(t + 1) * nD, :],
                        preferred_element_type=jnp.float32)
            acc = p if acc is None else acc + p
        h2 = acc + b2_ref[...]
    else:
        hu = jnp.concatenate([h1p[:, t:t + Wa, :] for t in range(Kmax)],
                             axis=-1).reshape(B * Wa, Kmax * nD)
        h2 = jnp.dot(hu, w2, preferred_element_type=jnp.float32) + b2_ref[...]
    h2 = jnp.maximum(h2, 0.0).reshape(B, Wa, nCo)         # f32

    # global max pool over the REAL sequence positions only
    feats = jnp.max(h2[:, :W_real, :], axis=1)            # (B, n_br*Co)

    # TODO(synk): nn.Dropout is identity at inference; training-mode masking omitted.
    h = jnp.dot(feats.astype(fc1_w_ref.dtype), fc1_w_ref[...],
                preferred_element_type=jnp.float32) + fc1_b_ref[...]
    h = jnp.maximum(h, 0.0)
    logits = jnp.dot(h.astype(fc2_w_ref.dtype), fc2_w_ref[...],
                     preferred_element_type=jnp.float32) + fc2_b_ref[...]
    o_ref[...] = logits.astype(o_ref.dtype)


# ---------------------------------------------------------------------------
# Fallback kernel for even kernel sizes (per-branch output lengths differ)
# ---------------------------------------------------------------------------
def _per_branch_kernel(Ks, W, D, Co, pad_max, *refs):
    n_br = len(Ks)
    x_ref = refs[0]
    conv_refs = refs[1:1 + 4 * n_br]
    fc1_w_ref, fc1_b_ref, fc2_w_ref, fc2_b_ref, o_ref = refs[1 + 4 * n_br:]

    x = x_ref[...]
    B = x.shape[0]
    cdt = x.dtype
    twoD = 2 * D

    pooled = []
    for bi, K in enumerate(Ks):
        w1_ref, b1_ref, w2_ref, b2_ref = conv_refs[4 * bi: 4 * bi + 4]
        pad = K // 2
        off = pad_max - pad
        W1 = W + 2 * pad - K + 1
        W2 = W1 + 2 * pad - K + 1

        xu = jnp.concatenate([x[:, off + k: off + k + W1, :] for k in range(K)],
                             axis=-1).reshape(B * W1, K * twoD)
        h1 = jnp.dot(xu, w1_ref[...],
                     preferred_element_type=jnp.float32) + b1_ref[...]
        h1 = jnp.maximum(h1, 0.0).astype(cdt).reshape(B, W1, D)  # cast early

        zpad = jnp.zeros((B, pad, D), cdt)
        h1p = jnp.concatenate([zpad, h1, zpad], axis=1)
        hu = jnp.concatenate([h1p[:, k: k + W2, :] for k in range(K)],
                             axis=-1).reshape(B * W2, K * D)
        h2 = jnp.dot(hu, w2_ref[...],
                     preferred_element_type=jnp.float32) + b2_ref[...]
        h2 = jnp.maximum(h2, 0.0).reshape(B, W2, Co)
        pooled.append(jnp.max(h2, axis=1))

    feats = jnp.concatenate(pooled, axis=-1)

    # TODO(synk): nn.Dropout is identity at inference; training-mode masking omitted.
    h = jnp.dot(feats.astype(fc1_w_ref.dtype), fc1_w_ref[...],
                preferred_element_type=jnp.float32) + fc1_b_ref[...]
    h = jnp.maximum(h, 0.0)
    logits = jnp.dot(h.astype(fc2_w_ref.dtype), fc2_w_ref[...],
                     preferred_element_type=jnp.float32) + fc2_b_ref[...]
    o_ref[...] = logits.astype(o_ref.dtype)


# ---------------------------------------------------------------------------
# Wrapper: one pallas_call for the whole model body
# ---------------------------------------------------------------------------
def deep_cnn_mui_forward(params, x_idx, *, block_n=None,
                         compute_dtype=jnp.bfloat16):
    """DEEP_CNN_MUI forward.  MXU operands use `compute_dtype` (default bf16)
    with f32 accumulation; all VPU math (bias/ReLU/max) stays f32."""
    Ks = tuple(int(k) for k in params["Ks"])
    n_br = len(Ks)
    Kmax = max(Ks)
    pad_max = max(k // 2 for k in Ks)
    all_odd = all(k % 2 == 1 for k in Ks)

    D = params["embed_no_static"].shape[1]
    Co = params["convs"][0][2].shape[1]
    C = params["fc2_w"].shape[1]
    N, W = x_idx.shape
    twoD = 2 * D
    nD = n_br * D
    nCo = n_br * Co
    dtb = np.dtype(compute_dtype).itemsize

    # ---- HBM pre-pass: cast to compute dtype BEFORE gather/stack/pad ----
    x_s = jnp.take(params["embed_static"].astype(compute_dtype), x_idx, axis=0)
    x_ns = jnp.take(params["embed_no_static"].astype(compute_dtype), x_idx, axis=0)
    # torch.stack([x_static, x_no_static], 1) -> channel 0 = static
    x_flat = jnp.stack([x_s, x_ns], axis=2).reshape(N, W, twoD)

    # sublane-align the conv output length (fused odd-K path only)
    Wa = _round_up(W, 8) if all_odd else W
    Wp = Wa + 2 * pad_max
    x_pad = jnp.pad(x_flat, ((0, 0), (pad_max, (Wa - W) + pad_max), (0, 0)))

    # ---- lane-dense head: pad fc2 output columns up to a multiple of 128 ----
    Cp = _round_up(C, 128)
    fc1_w = params["fc1_w"].astype(compute_dtype)
    fc1_b = params["fc1_b"]
    fc2_w = jnp.pad(params["fc2_w"], ((0, 0), (0, Cp - C))).astype(compute_dtype)
    fc2_b = jnp.pad(params["fc2_b"], ((0, 0), (0, Cp - C)))
    fc_inputs = [fc1_w, fc1_b, fc2_w, fc2_b]
    fc_specs = [pl.BlockSpec(a.shape, lambda n: (0, 0)) for a in fc_inputs]

    # ---- conv weights ----
    if all_odd:
        # block-diagonal combined weights (W1 == W2 == W for odd K)
        w1c = jnp.zeros((Kmax * twoD, nD), compute_dtype)
        b1c = jnp.zeros((1, nD), jnp.float32)
        w2c = jnp.zeros((Kmax * nD, nCo), compute_dtype)
        b2c = jnp.zeros((1, nCo), jnp.float32)
        for bi, (K, (w1, b1, w2, b2)) in enumerate(zip(Ks, params["convs"])):
            off = pad_max - K // 2          # tap offset into the shared unfold
            w1c = w1c.at[off * twoD:(off + K) * twoD,
                         bi * D:(bi + 1) * D].set(w1.astype(compute_dtype))
            b1c = b1c.at[:, bi * D:(bi + 1) * D].set(b1)
            w2r = w2.reshape(K, D, Co).astype(compute_dtype)
            for k in range(K):
                r0 = (off + k) * nD + bi * D
                w2c = w2c.at[r0:r0 + D, bi * Co:(bi + 1) * Co].set(w2r[k])
            b2c = b2c.at[:, bi * Co:(bi + 1) * Co].set(b2)
        conv_inputs = [w1c, b1c, w2c, b2c]
        kern = functools.partial(_fused_odd_kernel, Kmax, Wa, W, D, Co, n_br)
    else:
        # TODO(synk): even K gives per-branch output lengths; keep the per-branch path.
        conv_inputs = []
        for (w1, b1, w2, b2) in params["convs"]:
            conv_inputs += [w1.astype(compute_dtype), b1,
                            w2.astype(compute_dtype), b2]
        kern = functools.partial(_per_branch_kernel, Ks, W, D, Co, pad_max)
    conv_specs = [pl.BlockSpec(a.shape, lambda n: (0, 0)) for a in conv_inputs]

    # ---- chip-aware batch tile: VMEM budget + >=2 tiles for the v7x megacore ----
    vmem_limit = min(int(_vmem_capacity_bytes() * 3 // 4), 100 << 20)
    weight_bytes = sum(int(np.prod(a.shape)) * a.dtype.itemsize
                       for a in conv_inputs + fc_inputs)
    per = 2 * Wp * twoD * dtb                               # double-buffered input tile
    per += Wa * Kmax * twoD * dtb if twoD < 128 else 0      # conv1 im2col unfold
    per += Wa * nD * 4                                      # conv1 f32 activations
    per += (Wa + 2 * pad_max) * nD * dtb                    # padded h1 (compute dtype)
    per += Wa * Kmax * nD * dtb if nD < 128 else 0          # conv2 im2col unfold
    per += Wa * nCo * 4                                     # conv2 f32 activations
    per += 2 * Cp * 4                                       # double-buffered output tile
    per = int(per * 1.5) + 1                                # relayout/temporary headroom
    bn_cap = max(8, ((vmem_limit // 2 - weight_bytes) // per) // 8 * 8)
    bn_mega = max(8, _round_up(pl.cdiv(N, 2), 8))           # keep both v7x TCs busy
    bn = min(block_n if block_n else 1 << 30, bn_cap, bn_mega)
    bn = max(8, (bn // 8) * 8)

    n_tiles = pl.cdiv(N, bn)
    N_pad = n_tiles * bn
    if N_pad != N:
        x_pad = jnp.pad(x_pad, ((0, N_pad - N), (0, 0), (0, 0)))

    out = pl.pallas_call(
        kern,
        out_shape=jax.ShapeDtypeStruct((N_pad, Cp), jnp.float32),
        grid=(n_tiles,),
        in_specs=[pl.BlockSpec((bn, Wp, twoD), lambda n: (n, 0, 0))]
                 + conv_specs + fc_specs,
        out_specs=pl.BlockSpec((bn, Cp), lambda n: (n, 0)),
        compiler_params=pltpu.CompilerParams(
            dimension_semantics=("parallel",),
            vmem_limit_bytes=int(vmem_limit)),
    )(x_pad, *conv_inputs, *fc_inputs)
    return out[:N, :C]


# ---------------------------------------------------------------------------
# Pure-JAX reference (NCHW convs, matches the PyTorch graph) for validation
# ---------------------------------------------------------------------------
def ref_forward(params, x_idx):
    x_ns = jnp.take(params["embed_no_static"], x_idx, axis=0)
    x_s = jnp.take(params["embed_static"], x_idx, axis=0)
    x4 = jnp.stack([x_s, x_ns], axis=1)               # (N, 2, W, D)  NCHW
    outs = []
    for K, (w1t, b1, w2t, b2) in zip(params["Ks"], params["convs_torch"]):
        pad = K // 2
        y = lax.conv_general_dilated(
            x4, w1t, (1, 1), ((pad, pad), (0, 0)),
            dimension_numbers=("NCHW", "OIHW", "NCHW"),
            precision=lax.Precision.HIGHEST) + b1.reshape(1, -1, 1, 1)
        y = jnp.maximum(y, 0.0)[..., 0]               # (N, D, W1)
        y = jnp.transpose(y, (0, 2, 1))[:, None]      # (N, 1, W1, D)
        z = lax.conv_general_dilated(
            y, w2t, (1, 1), ((pad, pad), (0, 0)),
            dimension_numbers=("NCHW", "OIHW", "NCHW"),
            precision=lax.Precision.HIGHEST) + b2.reshape(1, -1, 1, 1)
        z = jnp.maximum(z, 0.0)[..., 0]               # (N, Co, W2)
        outs.append(jnp.max(z, axis=2))
    feats = jnp.concatenate(outs, axis=1)
    h = jnp.maximum(feats @ params["fc1_w"] + params["fc1_b"][0], 0.0)
    return h @ params["fc2_w"] + params["fc2_b"][0]


# ---------------------------------------------------------------------------
# Deterministic parameter construction (shapes follow the module __init__)
# ---------------------------------------------------------------------------
def make_params(key, V, V_mui, D, C, Co, Ks, pad_id, pad_id_mui):
    keys = iter(jax.random.split(key, 8 + 4 * len(Ks)))
    nk = lambda: next(keys)

    embed_no_static = jax.random.normal(nk(), (V, D), jnp.float32) * 0.1
    embed_no_static = embed_no_static.at[pad_id].set(0.0)       # padding_idx
    embed_static = jax.random.normal(nk(), (V_mui, D), jnp.float32) * 0.1
    embed_static = embed_static.at[pad_id_mui].set(0.0)         # padding_idx_mui

    convs, convs_torch = [], []
    for K in Ks:
        w1t = jax.random.normal(nk(), (D, 2, K, D), jnp.float32) / np.sqrt(2.0 * K * D)
        b1 = jax.random.normal(nk(), (1, D), jnp.float32) * 0.05
        w2t = jax.random.normal(nk(), (Co, 1, K, D), jnp.float32) / np.sqrt(1.0 * K * D)
        b2 = jax.random.normal(nk(), (1, Co), jnp.float32) * 0.05
        # torch layout (O, I, Kh, Kw=D) -> im2col layout (K*I*D, O) / (K*D, O)
        w1k = jnp.transpose(w1t, (2, 1, 3, 0)).reshape(K * 2 * D, D)
        w2k = jnp.transpose(w2t[:, 0], (1, 2, 0)).reshape(K * D, Co)
        convs.append((w1k, b1, w2k, b2))
        convs_torch.append((w1t, b1, w2t, b2))

    in_fea = len(Ks) * Co
    fc1_w = jax.random.normal(nk(), (in_fea, in_fea // 2), jnp.float32) / np.sqrt(in_fea)
    fc1_b = jax.random.normal(nk(), (1, in_fea // 2), jnp.float32) * 0.05
    fc2_w = jax.random.normal(nk(), (in_fea // 2, C), jnp.float32) / np.sqrt(in_fea // 2)
    fc2_b = jax.random.normal(nk(), (1, C), jnp.float32) * 0.05

    return dict(embed_no_static=embed_no_static, embed_static=embed_static,
                Ks=tuple(Ks), convs=convs, convs_torch=convs_torch,
                fc1_w=fc1_w, fc1_b=fc1_b, fc2_w=fc2_w, fc2_b=fc2_b)


if __name__ == "__main__":
    key = jax.random.PRNGKey(0)
    configs = [
        # fused branches, concat im2col path (2D < 128), W not multiple of 8
        dict(N=3, W=10, V=50, V_mui=60, D=32, Co=16, C=4, Ks=(3, 5)),
        # fused branches, accumulate-over-taps path (2D = n_br*D = 128)
        dict(N=2, W=12, V=40, V_mui=45, D=64, Co=16, C=5, Ks=(3, 5)),
        # mixed odd/even kernel sizes -> per-branch fallback path
        dict(N=2, W=8, V=30, V_mui=35, D=32, Co=8, C=3, Ks=(3, 4, 5)),
    ]
    for ci, cfg in enumerate(configs):
        k = jax.random.fold_in(key, ci)
        params = make_params(k, cfg["V"], cfg["V_mui"], cfg["D"], cfg["C"],
                             cfg["Co"], cfg["Ks"], 0, 0)
        x_idx = jax.random.randint(jax.random.fold_in(k, 999),
                                   (cfg["N"], cfg["W"]), 1,
                                   min(cfg["V"], cfg["V_mui"]))
        ref = jax.block_until_ready(ref_forward(params, x_idx))

        out32 = jax.block_until_ready(
            deep_cnn_mui_forward(params, x_idx, compute_dtype=jnp.float32))
        assert out32.shape == (cfg["N"], cfg["C"])
        np.testing.assert_allclose(np.asarray(out32), np.asarray(ref),
                                   atol=2e-3, rtol=2e-3)

        outbf = jax.block_until_ready(
            deep_cnn_mui_forward(params, x_idx, compute_dtype=jnp.bfloat16))
        np.testing.assert_allclose(np.asarray(outbf), np.asarray(ref),
                                   atol=8e-2, rtol=8e-2)
    print("KERNEL_OK")
</pallas_src>

<mosaic_0001>
module attributes {stable_mosaic.version = 11 : i64} {
  func.func @_fused_odd_kernel(%arg0: i32, %arg1: memref<8x20x64xf32, #tpu.memory_space<vmem>>, %arg2: memref<320x64xf32, #tpu.memory_space<vmem>>, %arg3: memref<1x64xf32, #tpu.memory_space<vmem>>, %arg4: memref<320x32xf32, #tpu.memory_space<vmem>>, %arg5: memref<1x32xf32, #tpu.memory_space<vmem>>, %arg6: memref<32x16xf32, #tpu.memory_space<vmem>>, %arg7: memref<1x16xf32, #tpu.memory_space<vmem>>, %arg8: memref<16x128xf32, #tpu.memory_space<vmem>>, %arg9: memref<1x128xf32, #tpu.memory_space<vmem>>, %arg10: memref<8x128xf32, #tpu.memory_space<vmem>>) attributes {dimension_semantics = [#tpu.dimension_semantics<parallel>], iteration_bounds = array<i64: 1>, scalar_prefetch = 0 : i64, scratch_operands = 0 : i64, tpu.core_type = #tpu.core_type<tc>, window_params = [{transform_indices = @transform_0, window_bounds = array<i64: 8, 20, 64>}, {pipeline_mode = #tpu.pipeline_mode<synchronous>, transform_indices = @transform_1, window_bounds = array<i64: 320, 64>}, {pipeline_mode = #tpu.pipeline_mode<synchronous>, transform_indices = @transform_2, window_bounds = array<i64: 1, 64>}, {pipeline_mode = #tpu.pipeline_mode<synchronous>, transform_indices = @transform_3, window_bounds = array<i64: 320, 32>}, {pipeline_mode = #tpu.pipeline_mode<synchronous>, transform_indices = @transform_4, window_bounds = array<i64: 1, 32>}, {pipeline_mode = #tpu.pipeline_mode<synchronous>, transform_indices = @transform_5, window_bounds = array<i64: 32, 16>}, {pipeline_mode = #tpu.pipeline_mode<synchronous>, transform_indices = @transform_6, window_bounds = array<i64: 1, 16>}, {pipeline_mode = #tpu.pipeline_mode<synchronous>, transform_indices = @transform_7, window_bounds = array<i64: 16, 128>}, {pipeline_mode = #tpu.pipeline_mode<synchronous>, transform_indices = @transform_8, window_bounds = array<i64: 1, 128>}, {transform_indices = @transform_9, window_bounds = array<i64: 8, 128>}]} {
    %c0 = arith.constant 0 : index
    %c0_0 = arith.constant 0 : index
    %c0_1 = arith.constant 0 : index
    %0 = vector.load %arg1[%c0, %c0_0, %c0_1] : memref<8x20x64xf32, #tpu.memory_space<vmem>>, vector<8x20x64xf32>
    %c0_2 = arith.constant 0 : index
    %c0_3 = arith.constant 0 : index
    %1 = vector.load %arg2[%c0_2, %c0_3] : memref<320x64xf32, #tpu.memory_space<vmem>>, vector<320x64xf32>
    %2 = vector.extract_strided_slice %0 {offsets = [0, 0, 0], sizes = [8, 16, 64], strides = [1, 1, 1]} : vector<8x20x64xf32> to vector<8x16x64xf32>
    %3 = vector.extract_strided_slice %0 {offsets = [0, 1, 0], sizes = [8, 16, 64], strides = [1, 1, 1]} : vector<8x20x64xf32> to vector<8x16x64xf32>
    %4 = vector.extract_strided_slice %0 {offsets = [0, 2, 0], sizes = [8, 16, 64], strides = [1, 1, 1]} : vector<8x20x64xf32> to vector<8x16x64xf32>
    %5 = vector.extract_strided_slice %0 {offsets = [0, 3, 0], sizes = [8, 16, 64], strides = [1, 1, 1]} : vector<8x20x64xf32> to vector<8x16x64xf32>
    %6 = vector.extract_strided_slice %0 {offsets = [0, 4, 0], sizes = [8, 16, 64], strides = [1, 1, 1]} : vector<8x20x64xf32> to vector<8x16x64xf32>
    %7 = tpu.concatenate %2, %3, %4, %5, %6 in 2 : vector<8x16x64xf32>, vector<8x16x64xf32>, vector<8x16x64xf32>, vector<8x16x64xf32>, vector<8x16x64xf32> -> vector<8x16x320xf32>
    %8 = vector.shape_cast %7 : vector<8x16x320xf32> to vector<128x320xf32>
    %cst = arith.constant dense<0.000000e+00> : vector<128x64xf32>
    %9 = tpu.matmul %8, %1, %cst {dimension_numbers = #tpu.dot_dimension_numbers<[1], [0], [0], [1], [0, 0, 1, 1], [], []>} : vector<128x320xf32>, vector<320x64xf32>, vector<128x64xf32> -> vector<128x64xf32>
    %c0_4 = arith.constant 0 : index
    %c0_5 = arith.constant 0 : index
    %10 = vector.load %arg3[%c0_4, %c0_5] : memref<1x64xf32, #tpu.memory_space<vmem>>, vector<1x64xf32>
    %11 = vector.broadcast %10 : vector<1x64xf32> to vector<128x64xf32>
    %12 = arith.addf %9, %11 : vector<128x64xf32>
    %cst_6 = arith.constant 0.000000e+00 : f32
    %13 = vector.broadcast %cst_6 : f32 to vector<128x64xf32>
    %14 = arith.maximumf %12, %13 : vector<128x64xf32>
    %15 = vector.shape_cast %14 : vector<128x64xf32> to vector<8x16x64xf32>
    %cst_7 = arith.constant 0.000000e+00 : f32
    %16 = vector.broadcast %cst_7 : f32 to vector<8x2x64xf32>
    %cst_8 = arith.constant 0.000000e+00 : f32
    %17 = vector.broadcast %cst_8 : f32 to vector<8x8x64xf32>
    %18 = vector.extract_strided_slice %15 {offsets = [0, 0, 0], sizes = [8, 10, 64], strides = [1, 1, 1]} : vector<8x16x64xf32> to vector<8x10x64xf32>
    %19 = tpu.concatenate %16, %18, %17 in 1 : vector<8x2x64xf32>, vector<8x10x64xf32>, vector<8x8x64xf32> -> vector<8x20x64xf32>
    %c0_9 = arith.constant 0 : index
    %c0_10 = arith.constant 0 : index
    %20 = vector.load %arg4[%c0_9, %c0_10] : memref<320x32xf32, #tpu.memory_space<vmem>>, vector<320x32xf32>
    %21 = vector.extract_strided_slice %19 {offsets = [0, 0, 0], sizes = [8, 16, 64], strides = [1, 1, 1]} : vector<8x20x64xf32> to vector<8x16x64xf32>
    %22 = vector.extract_strided_slice %19 {offsets = [0, 1, 0], sizes = [8, 16, 64], strides = [1, 1, 1]} : vector<8x20x64xf32> to vector<8x16x64xf32>
    %23 = vector.extract_strided_slice %19 {offsets = [0, 2, 0], sizes = [8, 16, 64], strides = [1, 1, 1]} : vector<8x20x64xf32> to vector<8x16x64xf32>
    %24 = vector.extract_strided_slice %19 {offsets = [0, 3, 0], sizes = [8, 16, 64], strides = [1, 1, 1]} : vector<8x20x64xf32> to vector<8x16x64xf32>
    %25 = vector.extract_strided_slice %19 {offsets = [0, 4, 0], sizes = [8, 16, 64], strides = [1, 1, 1]} : vector<8x20x64xf32> to vector<8x16x64xf32>
    %26 = tpu.concatenate %21, %22, %23, %24, %25 in 2 : vector<8x16x64xf32>, vector<8x16x64xf32>, vector<8x16x64xf32>, vector<8x16x64xf32>, vector<8x16x64xf32> -> vector<8x16x320xf32>
    %27 = vector.shape_cast %26 : vector<8x16x320xf32> to vector<128x320xf32>
    %cst_11 = arith.constant dense<0.000000e+00> : vector<128x32xf32>
    %28 = tpu.matmul %27, %20, %cst_11 {dimension_numbers = #tpu.dot_dimension_numbers<[1], [0], [0], [1], [0, 0, 1, 1], [], []>} : vector<128x320xf32>, vector<320x32xf32>, vector<128x32xf32> -> vector<128x32xf32>
    %c0_12 = arith.constant 0 : index
    %c0_13 = arith.constant 0 : index
    %29 = vector.load %arg5[%c0_12, %c0_13] : memref<1x32xf32, #tpu.memory_space<vmem>>, vector<1x32xf32>
    %30 = vector.broadcast %29 : vector<1x32xf32> to vector<128x32xf32>
    %31 = arith.addf %28, %30 : vector<128x32xf32>
    %cst_14 = arith.constant 0.000000e+00 : f32
    %32 = vector.broadcast %cst_14 : f32 to vector<128x32xf32>
    %33 = arith.maximumf %31, %32 : vector<128x32xf32>
    %34 = vector.shape_cast %33 : vector<128x32xf32> to vector<8x16x32xf32>
    %35 = vector.extract_strided_slice %34 {offsets = [0, 0, 0], sizes = [8, 10, 32], strides = [1, 1, 1]} : vector<8x16x32xf32> to vector<8x10x32xf32>
    %cst_15 = arith.constant dense<0xFF800000> : vector<8x32xf32>
    %36 = vector.multi_reduction <maximumf>, %35, %cst_15 [1] : vector<8x10x32xf32> to vector<8x32xf32>
    %c0_16 = arith.constant 0 : index
    %c0_17 = arith.constant 0 : index
    %37 = vector.load %arg6[%c0_16, %c0_17] : memref<32x16xf32, #tpu.memory_space<vmem>>, vector<32x16xf32>
    %cst_18 = arith.constant dense<0.000000e+00> : vector<8x16xf32>
    %38 = tpu.matmul %36, %37, %cst_18 {dimension_numbers = #tpu.dot_dimension_numbers<[1], [0], [0], [1], [0, 0, 1, 1], [], []>} : vector<8x32xf32>, vector<32x16xf32>, vector<8x16xf32> -> vector<8x16xf32>
    %c0_19 = arith.constant 0 : index
    %c0_20 = arith.constant 0 : index
    %39 = vector.load %arg7[%c0_19, %c0_20] : memref<1x16xf32, #tpu.memory_space<vmem>>, vector<1x16xf32>
    %40 = vector.broadcast %39 : vector<1x16xf32> to vector<8x16xf32>
    %41 = arith.addf %38, %40 : vector<8x16xf32>
    %cst_21 = arith.constant 0.000000e+00 : f32
    %42 = vector.broadcast %cst_21 : f32 to vector<8x16xf32>
    %43 = arith.maximumf %41, %42 : vector<8x16xf32>
    %c0_22 = arith.constant 0 : index
    %c0_23 = arith.constant 0 : index
    %44 = vector.load %arg8[%c0_22, %c0_23] : memref<16x128xf32, #tpu.memory_space<vmem>>, vector<16x128xf32>
    %cst_24 = arith.constant dense<0.000000e+00> : vector<8x128xf32>
    %45 = tpu.matmul %43, %44, %cst_24 {dimension_numbers = #tpu.dot_dimension_numbers<[1], [0], [0], [1], [0, 0, 1, 1], [], []>} : vector<8x16xf32>, vector<16x128xf32>, vector<8x128xf32> -> vector<8x128xf32>
    %c0_25 = arith.constant 0 : index
    %c0_26 = arith.constant 0 : index
    %46 = vector.load %arg9[%c0_25, %c0_26] : memref<1x128xf32, #tpu.memory_space<vmem>>, vector<1x128xf32>
    %47 = vector.broadcast %46 : vector<1x128xf32> to vector<8x128xf32>
    %48 = arith.addf %45, %47 : vector<8x128xf32>
    %c0_27 = arith.constant 0 : index
    %c0_28 = arith.constant 0 : index
    %49 = vector.load %arg10[%c0_27, %c0_28] : memref<8x128xf32, #tpu.memory_space<vmem>>, vector<8x128xf32>
    tpu.vector_store %arg10[%c0_27, %c0_28], %48 {strides = array<i32>} : memref<8x128xf32, #tpu.memory_space<vmem>>, vector<8x128xf32>,
    return
  }
  func.func @transform_0(%arg0: i32) -> (i32, i32, i32) {
    %c0_i32 = arith.constant 0 : i32
    %c0_i32_0 = arith.constant 0 : i32
    %c0_i32_1 = arith.constant 0 : i32
    return %arg0, %c0_i32, %c0_i32_0 : i32, i32, i32
  }
  func.func @transform_1(%arg0: i32) -> (i32, i32) {
    %c0_i32 = arith.constant 0 : i32
    %c0_i32_0 = arith.constant 0 : i32
    %c0_i32_1 = arith.constant 0 : i32
    return %c0_i32, %c0_i32_0 : i32, i32
  }
  func.func @transform_2(%arg0: i32) -> (i32, i32) {
    %c0_i32 = arith.constant 0 : i32
    %c0_i32_0 = arith.constant 0 : i32
    %c0_i32_1 = arith.constant 0 : i32
    return %c0_i32, %c0_i32_0 : i32, i32
  }
  func.func @transform_3(%arg0: i32) -> (i32, i32) {
    %c0_i32 = arith.constant 0 : i32
    %c0_i32_0 = arith.constant 0 : i32
    %c0_i32_1 = arith.constant 0 : i32
    return %c0_i32, %c0_i32_0 : i32, i32
  }
  func.func @transform_4(%arg0: i32) -> (i32, i32) {
    %c0_i32 = arith.constant 0 : i32
    %c0_i32_0 = arith.constant 0 : i32
    %c0_i32_1 = arith.constant 0 : i32
    return %c0_i32, %c0_i32_0 : i32, i32
  }
  func.func @transform_5(%arg0: i32) -> (i32, i32) {
    %c0_i32 = arith.constant 0 : i32
    %c0_i32_0 = arith.constant 0 : i32
    %c0_i32_1 = arith.constant 0 : i32
    return %c0_i32, %c0_i32_0 : i32, i32
  }
  func.func @transform_6(%arg0: i32) -> (i32, i32) {
    %c0_i32 = arith.constant 0 : i32
    %c0_i32_0 = arith.constant 0 : i32
    %c0_i32_1 = arith.constant 0 : i32
    return %c0_i32, %c0_i32_0 : i32, i32
  }
  func.func @transform_7(%arg0: i32) -> (i32, i32) {
    %c0_i32 = arith.constant 0 : i32
    %c0_i32_0 = arith.constant 0 : i32
    %c0_i32_1 = arith.constant 0 : i32
    return %c0_i32, %c0_i32_0 : i32, i32
  }
  func.func @transform_8(%arg0: i32) -> (i32, i32) {
    %c0_i32 = arith.constant 0 : i32
    %c0_i32_0 = arith.constant 0 : i32
    %c0_i32_1 = arith.constant 0 : i32
    return %c0_i32, %c0_i32_0 : i32, i32
  }
  func.func @transform_9(%arg0: i32) -> (i32, i32) {
    %c0_i32 = arith.constant 0 : i32
    %c0_i32_0 = arith.constant 0 : i32
    return %arg0, %c0_i32 : i32, i32
  }
}

</mosaic_0001>

<bundles_post_ra>
// kernel: tpu_custom_call.1
= control target key start
LH: loop header
LB: loop body
LE: loop exit
PB: predicated region body
PF: predicated region fallthrough
CT: control target
= control target key end

     0   :  { %vm121_vm0 = vcmask 1046528   ;;  %vm267_vm1 = vcmask 1044480   ;;  %s2450_s29 = smov 64   ;;  %s3596_s0 = inlined_call_operand.vmem [shape: f32[8,20,64], index: 0, kind: input, shape index: {}]   ;;  %s3597_s1 = inlined_call_operand.vmem [shape: f32[320,64], index: 1, kind: input, shape index: {}]   ;;  %s3598_s2 = inlined_call_operand.vmem [shape: f32[1,64], index: 2, kind: input, shape index: {}]   ;;  %s3599_s3 = inlined_call_operand.vmem [shape: f32[320,32], index: 3, kind: input, shape index: {}]   ;;  %s3600_s4 = inlined_call_operand.vmem [shape: f32[1,32], index: 4, kind: input, shape index: {}]   ;;  %s3601_s5 = inlined_call_operand.vmem [shape: f32[32,16], index: 5, kind: input, shape index: {}]   ;;  %s3602_s6 = inlined_call_operand.vmem [shape: f32[1,16], index: 6, kind: input, shape index: {}]   ;;  %s3603_s7 = inlined_call_operand.vmem [shape: f32[16,128], index: 7, kind: input, shape index: {}]   ;;  %s3604_s8 = inlined_call_operand.vmem [shape: f32[1,128], index: 8, kind: input, shape index: {}]   ;;  %s3605_s9 = inlined_call_operand.hbm [shape: f32[8,128], index: 9, kind: output, shape index: {}]  }
   0x1   :  { %v2508_v0 = vld [vmem:[%s3596_s0] sm:$0xff]  ;;  %v2513_v1 = vld [vmem:[%s3596_s0 + $0x8] sm:$0xff]  ;;  %v2518_v2 = vld [vmem:[%s3596_s0 + $0x18] sm:$0xff] }
   0x2   :  { %v122_v3 = vrot.slane %v2508_v0, 1  ;;  %v123_v4 = vrot.slane %v2513_v1, 1  ;;  %v268_v5 = vrot.slane %v2508_v0, 3  ;;  %v269_v6 = vrot.slane %v2513_v1, 3  ;;  %v2527_v7 = vld [vmem:[%s3596_s0 + $0x10] sm:$0xf] }
   0x3   :  { %v125_v8 = vrot.slane %v2527_v7, 1  ;;  %v271_v9 = vrot.slane %v2527_v7, 3  ;;  %v2534_v10 = vld [vmem:[%s3596_s0 + $0x20] sm:$0xff]  ;;  %v127_v11 = vrot.slane %v2518_v2, 1  ;;  %v273_v12 = vrot.slane %v2518_v2, 3  ;;  %v2550_v18 = vld [vmem:[%s3596_s0 + $0x30] sm:$0xff] }
   0x4   :  { %v124_v13 = vsel %vm121_vm0, %v122_v3, %v123_v4  ;;  %v270_v14 = vsel %vm267_vm1, %v268_v5, %v269_v6  ;;  %v128_v15 = vrot.slane %v2534_v10, 1  ;;  %v274_v16 = vrot.slane %v2534_v10, 3  ;;  %v2545_v17 = vld [vmem:[%s3596_s0 + $0x28] sm:$0xf]  ;;  %v2555_v19 = vld [vmem:[%s3596_s0 + $0x38] sm:$0xff]  ;;  %v2580_v34 = vld [vmem:[%s3596_s0 + $0x50] sm:$0xff] }
   0x5   :  { %v2266_v20 = vpack.i.bf16 %v124_v13, %v270_v14  ;;  %v126_v21 = vsel %vm121_vm0, %v123_v4, %v125_v8  ;;  %v272_v22 = vsel %vm267_vm1, %v269_v6, %v271_v9  ;;  %v130_v23 = vrot.slane %v2545_v17, 1  ;;  %v2563_v24 = vld [vmem:[%s3596_s0 + $0x40] sm:$0xf]  ;;  %v2571_v29 = vld [vmem:[%s3596_s0 + $0x48] sm:$0xff]  ;;  %v2589_v39 = vld [vmem:[%s3596_s0 + $0x58] sm:$0xf] }
   0x6   :  { %v2271_v25 = vpack.i.bf16 %v126_v21, %v272_v22  ;;  %v129_v26 = vsel %vm121_vm0, %v127_v11, %v128_v15  ;;  %v275_v27 = vsel %vm267_vm1, %v273_v12, %v274_v16  ;;  %v276_v28 = vrot.slane %v2545_v17, 3  ;;  %v2598_v44 = vld [vmem:[%s3596_s0 + $0x60] sm:$0xff]  ;;  %v2607_v49 = vld [vmem:[%s3596_s0 + $0x68] sm:$0xff]  ;;  %v2616_v54 = vld [vmem:[%s3596_s0 + $0x70] sm:$0xf] }
   0x7   :  { %2267 = vrot.lane.b32.xlu0 %v2266_v20, %s2450_s29  ;;  %v2276_v30 = vpack.i.bf16 %v129_v26, %v275_v27  ;;  %v131_v31 = vsel %vm121_vm0, %v128_v15, %v130_v23  ;;  %v132_v32 = vrot.slane %v2550_v18, 1  ;;  %v133_v33 = vrot.slane %v2555_v19, 1  ;;  %v2628_v62 = vld [vmem:[%s3596_s0 + $0x78] sm:$0xff]  ;;  %v2633_v63 = vld [vmem:[%s3596_s0 + $0x80] sm:$0xff]  ;;  %v2645_v12 = vld [vmem:[%s3596_s0 + $0x88] sm:$0xf] }
   0x8   :  { %v277_v35 = vsel %vm267_vm1, %v274_v16, %v276_v28  ;;  %v278_v36 = vrot.slane %v2550_v18, 3  ;;  %v279_v37 = vrot.slane %v2555_v19, 3  ;;  %v135_v38 = vrot.slane %v2563_v24, 1  ;;  %v2654_v20 = vld [vmem:[%s3596_s0 + $0x90] sm:$0xff]  ;;  %v2659_v21 = vld [vmem:[%s3596_s0 + $0x98] sm:$0xff] }
   0x9   :  { %2277 = vrot.lane.b32.xlu1 %v2276_v30, %s2450_s29  ;;  %v2281_v40 = vpack.i.bf16 %v131_v31, %v277_v35  ;;  %v134_v41 = vsel %vm121_vm0, %v132_v32, %v133_v33  ;;  %v281_v42 = vrot.slane %v2563_v24, 3  ;;  %v137_v43 = vrot.slane %v2571_v29, 1  ;;  %v2674_v35 = vld [vmem:[%s3596_s0 + $0xa0] sm:$0xf] }
   0xa   :  { %v280_v45 = vsel %vm267_vm1, %v278_v36, %v279_v37  ;;  %v136_v46 = vsel %vm121_vm0, %v133_v33, %v135_v38  ;;  %v138_v47 = vrot.slane %v2580_v34, 1  ;;  %v283_v48 = vrot.slane %v2571_v29, 3 }
   0xb   :  { %2272 = vrot.lane.b32.xlu0 %v2271_v25, %s2450_s29  ;;  %v2286_v50 = vpack.i.bf16 %v134_v41, %v280_v45  ;;  %v282_v51 = vsel %vm267_vm1, %v279_v37, %v281_v42  ;;  %v284_v52 = vrot.slane %v2580_v34, 3  ;;  %v140_v53 = vrot.slane %v2589_v39, 1  ;;  %v2687_v41 = vld [vmem:[%s3596_s0 + $0xb0] sm:$0xff]  ;;  %v74_v45 = vld [vmem:[%s3597_s1 + $0x88] sm:$0xff] }
   0xc   :  { %v139_v55 = vsel %vm121_vm0, %v137_v43, %v138_v47  ;;  %v286_v56 = vrot.slane %v2589_v39, 3  ;;  %v142_v57 = vrot.slane %v2598_v44, 1  ;;  %v2291_v58 = vpack.i.bf16 %v136_v46, %v282_v51  ;;  %v73_v43 = vld [vmem:[%s3597_s1 + $0x80] sm:$0xff] }
   0xd   :  { %2282 = vrot.lane.b32.xlu1 %v2281_v40, %s2450_s29  ;;  %v285_v59 = vsel %vm267_vm1, %v283_v48, %v284_v52  ;;  %v143_v60 = vrot.slane %v2607_v49, 1  ;;  %v288_v61 = vrot.slane %v2598_v44, 3  ;;  %v141_v3 = vsel %vm121_vm0, %v138_v47, %v140_v53  ;;  %v2682_v40 = vld [vmem:[%s3596_s0 + $0xa8] sm:$0xff]  ;;  %v57_v46 = vld [vmem:[%s3597_s1] sm:$0xff]  ;;  %v75_v53 = vld [vmem:[%s3597_s1 + $0x90] sm:$0xff] }
   0xe   :  { %v287_v4 = vsel %vm267_vm1, %v284_v52, %v286_v56  ;;  %v289_v5 = vrot.slane %v2607_v49, 3  ;;  %v145_v6 = vrot.slane %v2616_v54, 1  ;;  %v2296_v8 = vpack.i.bf16 %v139_v55, %v285_v59  ;;  %v58_v52 = vld [vmem:[%s3597_s1 + $0x8] sm:$0xff]  ;;  %v76_v55 = vld [vmem:[%s3597_s1 + $0x98] sm:$0xff] }
   0xf   :  { %2287 = vrot.lane.b32.xlu0 %v2286_v50, %s2450_s29  ;;  %v144_v9 = vsel %vm121_vm0, %v142_v57, %v143_v60  ;;  %v291_v11 = vrot.slane %v2616_v54, 3  ;;  %v147_v14 = vrot.slane %v2628_v62, 1  ;;  %v148_v15 = vrot.slane %v2633_v63, 1 }
  0x10   :  { %v290_v13 = vsel %vm267_vm1, %v288_v61, %v289_v5  ;;  %v293_v16 = vrot.slane %v2628_v62, 3  ;;  %v2301_v22 = vpack.i.bf16 %v141_v3, %v287_v4  ;;  %v294_v23 = vrot.slane %v2633_v63, 3 }
  0x11   :  { %2292 = vrot.lane.b32.xlu1 %v2291_v58, %s2450_s29  ;;  %v146_v25 = vsel %vm121_vm0, %v143_v60, %v145_v6  ;;  %v292_v26 = vsel %vm267_vm1, %v289_v5, %v291_v11  ;;  %v150_v27 = vrot.slane %v2645_v12, 1  ;;  %v296_v28 = vrot.slane %v2645_v12, 3  ;;  %v2719_v60 = vld [vmem:[%s3596_s0 + $0xb8] sm:$0xf] }
  0x12   :  { %v2306_v30 = vpack.i.bf16 %v144_v9, %v290_v13  ;;  %v152_v31 = vrot.slane %v2654_v20, 1  ;;  %v153_v32 = vrot.slane %v2659_v21, 1  ;;  %v298_v33 = vrot.slane %v2654_v20, 3 }
  0x13   :  { %2297 = vrot.lane.b32.xlu0 %v2296_v8, %s2450_s29  ;;  %v149_v36 = vsel %vm121_vm0, %v147_v14, %v148_v15  ;;  %v295_v37 = vsel %vm267_vm1, %v293_v16, %v294_v23  ;;  %v299_v38 = vrot.slane %v2659_v21, 3  ;;  %v2311_v42 = vpack.i.bf16 %v146_v25, %v292_v26 }
  0x14   :  { %v151_v47 = vsel %vm121_vm0, %v148_v15, %v150_v27  ;;  %v297_v48 = vsel %vm267_vm1, %v294_v23, %v296_v28  ;;  %v155_v50 = vrot.slane %v2674_v35, 1  ;;  %v301_v51 = vrot.slane %v2674_v35, 3 }
  0x15   :  { %2302 = vrot.lane.b32.xlu1 %v2301_v22, %s2450_s29  ;;  %v2316_v56 = vpack.i.bf16 %v149_v36, %v295_v37  ;;  %v154_v57 = vsel %vm121_vm0, %v152_v31, %v153_v32  ;;  %v300_v58 = vsel %vm267_vm1, %v298_v33, %v299_v38  ;;  %v157_v59 = vrot.slane %v2682_v40, 1 }
  0x17   :  { %2307 = vrot.lane.b32.xlu0 %v2306_v30, %s2450_s29 }
  0x18   :  { %14 = vsyncpa [#allocation3], 0  ;;  %v158_v61 = vrot.slane %v2687_v41, 1  ;;  %v303_v3 = vrot.slane %v2682_v40, 3  ;;  %v304_v4 = vrot.slane %v2687_v41, 3  ;;  %v2156_v5 = vpack.c.bf16 %v74_v45, %v73_v43  ;;  %v59_v6 = vld [vmem:[%s3597_s1 + $0x10] sm:$0xff] }
  0x19   :  { %v60_v8 = vld [vmem:[%s3597_s1 + $0x18] sm:$0xff]  ;;  %2312 = vrot.lane.b32.xlu1 %v2311_v42, %s2450_s29  ;;  %v2321_v9 = vpack.i.bf16 %v151_v47, %v297_v48  ;;  %v2158_v11 = vpack.c.bf16 %v58_v52, %v57_v46  ;;  %v2160_v13 = vpack.c.bf16 %v76_v55, %v75_v53  ;;  %v77_v14 = vld [vmem:[%s3597_s1 + $0xa0] sm:$0xff]  ;;  %v78_v15 = vld [vmem:[%s3597_s1 + $0xa8] sm:$0xff]  ;;  %v156_v16 = vsel %vm121_vm0, %v153_v32, %v155_v50  ;;  %s2454_s19 = smov [#allocation2]  }
  0x1a   :  { %v302_v22 = vsel %vm267_vm1, %v299_v38, %v301_v51  ;;  %v160_v23 = vrot.slane %v2719_v60, 1  ;;  %v306_v25 = vrot.slane %v2719_v60, 3  ;;  %2157 = vmatprep.subr.bf16.mxu0 %v2156_v5  ;;  %v89_v26 = vld [vmem:[%s3597_s1 + $0x100] sm:$0xff]  ;;  %v90_v27 = vld [vmem:[%s3597_s1 + $0x108] sm:$0xff]  ;;  %v2326_v28 = vpack.i.bf16 %v154_v57, %v300_v58  ;;  %v91_v31 = vld [vmem:[%s3597_s1 + $0x110] sm:$0xff]  ;;  %s1796_s20 = sshll.u32 %s2454_s19, 4  ;;  %s1797_s20 = int_to_ptr.vmem [resolvable:$true] %s1796_s20 }
  0x1b   :  { %2317 = vrot.lane.b32.xlu0 %v2316_v56, %s2450_s29  ;;  %2159 = vmatpush3.bf16.msra.mxu0 %v2158_v11  ;;  %v2162_v30 = vpack.c.bf16 %v60_v8, %v59_v6  ;;  %v92_v32 = vld [vmem:[%s3597_s1 + $0x118] sm:$0xff]  ;;  %v159_v33 = vsel %vm121_vm0, %v157_v59, %v158_v61  ;;  %v305_v36 = vsel %vm267_vm1, %v303_v3, %v304_v4  ;;  %v61_v38 = vld [vmem:[%s3597_s1 + $0x20] sm:$0xff]  ;;  %v62_v42 = vld [vmem:[%s3597_s1 + $0x28] sm:$0xff]  ;;  %vm356_vm2 = vcmask 1043456   ;;  %p2431_p1 = scmp.lt.s32.totalorder %s1797_s20, %s1797_s20 }
  0x1c   :  { %2161 = vmatprep.subr.bf16.mxu0 %v2160_v13  ;;  %v2164_v37 = vpack.c.bf16 %v78_v15, %v77_v14  ;;  %v2331_v43 = vpack.i.bf16 %v156_v16, %v302_v22  ;;  %v79_v45 = vld [vmem:[%s3597_s1 + $0xb0] sm:$0xff]  ;;  %v80_v46 = vld [vmem:[%s3597_s1 + $0xb8] sm:$0xff]  ;;  %v2188_v47 = vpack.c.bf16 %v90_v27, %v89_v26  ;;  %v161_v48 = vsel %vm121_vm0, %v158_v61, %v160_v23  ;;  %v93_v55 = vld [vmem:[%s3597_s1 + $0x120] sm:$0xff] }
  0x1d   :  { %2322 = vrot.lane.b32.xlu1 %v2321_v9, %s2450_s29  ;;  %v307_v50 = vsel %vm267_vm1, %v304_v4, %v306_v25  ;;  %v2192_v51 = vpack.c.bf16 %v92_v32, %v91_v31  ;;  %v2336_v52 = vpack.i.bf16 %v159_v33, %v305_v36  ;;  %v2166_v53 = vpack.c.bf16 %v62_v42, %v61_v38  ;;  %v94_v56 = vld [vmem:[%s3597_s1 + $0x128] sm:$0xff]  ;;  %v63_v58 = vld [vmem:[%s3597_s1 + $0x30] sm:$0xff]  ;;  %v64_v59 = vld [vmem:[%s3597_s1 + $0x38] sm:$0xff] }
  0x1e   :  { %v2168_v57 = vpack.c.bf16 %v80_v46, %v79_v45  ;;  %2189 = vmatprep.subr.bf16.mxu1 %v2188_v47  ;;  %v357_v61 = vrot.slane %v2508_v0, 4  ;;  %v358_v3 = vrot.slane %v2513_v1, 4  ;;  %v2341_v4 = vpack.i.bf16 %v161_v48, %v307_v50  ;;  %v81_v5 = vld [vmem:[%s3597_s1 + $0xc0] sm:$0xff]  ;;  %v82_v6 = vld [vmem:[%s3597_s1 + $0xc8] sm:$0xff]  ;;  %v95_v13 = vld [vmem:[%s3597_s1 + $0x130] sm:$0xff] }
  0x1f   :  { %2327 = vrot.lane.b32.xlu0 %v2326_v28, %s2450_s29  ;;  %2163 = vmatpush3.bf16.msra.mxu0 %v2162_v30  ;;  %v2196_v8 = vpack.c.bf16 %v94_v56, %v93_v55  ;;  %v2170_v11 = vpack.c.bf16 %v64_v59, %v63_v58  ;;  %vm397_vm3 = vcmask 523264   ;;  %v96_v14 = vld [vmem:[%s3597_s1 + $0x138] sm:$0xff]  ;;  %v2172_v15 = vpack.c.bf16 %v82_v6, %v81_v5  ;;  %v65_v16 = vld [vmem:[%s3597_s1 + $0x40] sm:$0xff]  ;;  %v66_v22 = vld [vmem:[%s3597_s1 + $0x48] sm:$0xff] }
  0x20   :  { %2165 = vmatprep.subr.bf16.mxu0 %v2164_v37  ;;  %2191 = vmatpush3.bf16.msra.mxu1 %v2188_v47  ;;  %v359_v9 = vsel %vm356_vm2, %v357_v61, %v358_v3  ;;  %v83_v23 = vld [vmem:[%s3597_s1 + $0xd0] sm:$0xff]  ;;  %v84_v25 = vld [vmem:[%s3597_s1 + $0xd8] sm:$0xff]  ;;  %v2200_v26 = vpack.c.bf16 %v96_v14, %v95_v13  ;;  %v2174_v27 = vpack.c.bf16 %v66_v22, %v65_v16  ;;  %v85_v32 = vld [vmem:[%s3597_s1 + $0xe0] sm:$0xff]  ;;  %v360_v36 = vrot.slane %v2527_v7, 4 }
  0x21   :  { %2332 = vrot.lane.b32.xlu1 %v2331_v43, %s2450_s29  ;;  %2193 = vmatprep.subr.bf16.mxu1 %v2192_v51  ;;  %v2176_v28 = vpack.c.bf16 %v84_v25, %v83_v23  ;;  %v67_v30 = vld [vmem:[%s3597_s1 + $0x50] sm:$0xff]  ;;  %v68_v31 = vld [vmem:[%s3597_s1 + $0x58] sm:$0xff]  ;;  %v86_v33 = vld [vmem:[%s3597_s1 + $0xe8] sm:$0xff]  ;;  %v362_v37 = vrot.slane %v2518_v2, 4  ;;  %v363_v38 = vrot.slane %v2534_v10, 4  ;;  %v368_v55 = vrot.slane %v2555_v19, 4 }
  0x22   :  { %2074 = vmatprep.mubr.msk.f32.mxu1 %vm397_vm3, %v359_v9  ;;  %v2178_v42 = vpack.c.bf16 %v68_v31, %v67_v30  ;;  %v2180_v43 = vpack.c.bf16 %v86_v33, %v85_v32  ;;  %v69_v45 = vld [vmem:[%s3597_s1 + $0x60] sm:$0xff]  ;;  %v70_v46 = vld [vmem:[%s3597_s1 + $0x68] sm:$0xff]  ;;  %v87_v47 = vld [vmem:[%s3597_s1 + $0xf0] sm:$0xff]  ;;  %v361_v50 = vsel %vm356_vm2, %v358_v3, %v360_v36  ;;  %v370_v3 = vrot.slane %v2563_v24, 4 }
  0x23   :  { %2337 = vrot.lane.b32.xlu0 %v2336_v52, %s2450_s29  ;;  %2167 = vmatpush3.bf16.msra.mxu0 %v2166_v53  ;;  %v88_v48 = vld [vmem:[%s3597_s1 + $0xf8] sm:$0xff]  ;;  %v364_v52 = vsel %vm356_vm2, %v362_v37, %v363_v38  ;;  %v367_v53 = vrot.slane %v2550_v18, 4  ;;  %v2182_v56 = vpack.c.bf16 %v70_v46, %v69_v45  ;;  %v71_v58 = vld [vmem:[%s3597_s1 + $0x70] sm:$0xff]  ;;  %v372_v5 = vrot.slane %v2571_v29, 4 }
  0x24   :  { %2169 = vmatprep.subr.bf16.mxu0 %v2168_v57  ;;  %2195 = vmatpush3.bf16.msra.mxu1 %v2192_v51  ;;  %v365_v51 = vrot.slane %v2545_v17, 4  ;;  %v2184_v57 = vpack.c.bf16 %v88_v48, %v87_v47  ;;  %v72_v59 = vld [vmem:[%s3597_s1 + $0x78] sm:$0xff]  ;;  %v373_v6 = vrot.slane %v2580_v34, 4  ;;  %v371_v9 = vsel %vm356_vm2, %v368_v55, %v370_v3 }
  0x25   :  { %2342 = vrot.lane.b32.xlu1 %v2341_v4, %s2450_s29  ;;  %2197 = vmatprep.subr.bf16.mxu1 %v2196_v8  ;;  %v369_v4 = vsel %vm356_vm2, %v367_v53, %v368_v55  ;;  %v377_v14 = vrot.slane %v2598_v44, 4  ;;  %v380_v22 = vrot.slane %v2616_v54, 4  ;;  %v382_v25 = vrot.slane %v2628_v62, 4 }
  0x26   :  { %v366_v61 = vsel %vm356_vm2, %v363_v38, %v365_v51  ;;  %v374_v13 = vsel %vm356_vm2, %v372_v5, %v373_v6  ;;  %v387_v31 = vrot.slane %v2654_v20, 4  ;;  %v388_v32 = vrot.slane %v2659_v21, 4 }
  0x27   :  { %2171 = vmatpush3.bf16.msra.mxu0 %v2170_v11  ;;  %v375_v11 = vrot.slane %v2589_v39, 4  ;;  %v390_v36 = vrot.slane %v2674_v35, 4  ;;  %v392_v38 = vrot.slane %v2682_v40, 4  ;;  %v395_v45 = vrot.slane %v2719_v60, 4 }
  0x28   :  { %2173 = vmatprep.subr.bf16.mxu0 %v2172_v15  ;;  %2199 = vmatpush3.bf16.msra.mxu1 %v2196_v8  ;;  %v2186_v8 = vpack.c.bf16 %v72_v59, %v71_v58  ;;  %v378_v15 = vrot.slane %v2607_v49, 4  ;;  %v389_v37 = vsel %vm356_vm2, %v387_v31, %v388_v32  ;;  %v211_v48 = vrot.slane %v2508_v0, 2 }
  0x29   :  { %2201 = vmatprep.subr.bf16.mxu1 %v2200_v26  ;;  %v376_v16 = vsel %vm356_vm2, %v373_v6, %v375_v11  ;;  %vm210_vm4 = vcmask 1045504   ;;  %v214_v53 = vrot.slane %v2527_v7, 2  ;;  %v216_v55 = vrot.slane %v2518_v2, 2 }
  0x2a   :  { %v379_v23 = vsel %vm356_vm2, %v377_v14, %v378_v15  ;;  %v219_v7 = vrot.slane %v2545_v17, 2  ;;  %v222_v17 = vrot.slane %v2555_v19, 2  ;;  %vm791_vm5 = vcmask 1041408  }
  0x2b   :  { %2175 = vmatpush3.bf16.msra.mxu0 %v2174_v27  ;;  %v381_v27 = vsel %vm356_vm2, %v378_v15, %v380_v22  ;;  %vm2453_vm6 = vmmov 0   ;;  %vm1526_vm7 = vcmask 261120   ;;  %vm1528_vm8 = vcmask 254976  }
  0x2c   :  { %2177 = vmatprep.subr.bf16.mxu0 %v2176_v28  ;;  %2203 = vmatpush3.bf16.msra.mxu1 %v2200_v26  ;;  %v383_v26 = vrot.slane %v2633_v63, 4  ;;  %v385_v28 = vrot.slane %v2645_v12, 4  ;;  %vm1619_vm9 = vcmask 1041409   ;;  %vm1621_vm10 = vcmask 1042434  }
  0x2d   :  { %vm1623_vm11 = vcmask 1043459   ;;  %vm1625_vm12 = vcmask 1044484   ;;  %vm1627_vm13 = vcmask 1045509   ;;  %vm1629_vm14 = vcmask 1046534  }
  0x2e   :  { %v384_v30 = vsel %vm356_vm2, %v382_v25, %v383_v26  ;;  %v386_v33 = vsel %vm356_vm2, %v383_v26, %v385_v28  ;;  %v221_v26 = vrot.slane %v2550_v18, 2  ;;  %vm1631_vm15 = vcmask 1047559  }
  0x2f   :  { %2179 = vmatpush3.bf16.msra.mxu0 %v2178_v42  ;;  %2075 = vmatmul.mubr.msk.f32.vlgmr.msra.gmra.mrb[0].mxu1 %vm397_vm3, %v361_v50  ;;  %v393_v42 = vrot.slane %v2687_v41, 4  ;;  %v212_v50 = vrot.slane %v2513_v1, 2 }
  0x30   :  { %2181 = vmatprep.subr.bf16.mxu0 %v2180_v43  ;;  %2077 = vmatprep.mubr.msk.f32.mxu1 %vm397_vm3, %v364_v52  ;;  %v391_v43 = vsel %vm356_vm2, %v388_v32, %v390_v36  ;;  %v223_v32 = vsel %vm210_vm4, %v221_v26, %v222_v17  ;;  %v239_v26 = vrot.slane %v2645_v12, 2 }
  0x31   :  { %v394_v46 = vsel %vm356_vm2, %v392_v38, %v393_v42  ;;  %v396_v47 = vsel %vm356_vm2, %v393_v42, %v395_v45  ;;  %v213_v52 = vsel %vm210_vm4, %v211_v48, %v212_v50  ;;  %v215_v6 = vsel %vm210_vm4, %v212_v50, %v214_v53 }
  0x32   :  { %v226_v45 = vrot.slane %v2571_v29, 2 }
  0x33   :  { %2183 = vmatpush3.bf16.msra.mxu0 %v2182_v56  ;;  %2078 = vmatmul.mubr.msk.f32.gmra.mrb[2].mxu1 %vm397_vm3, %v366_v61  ;;  %v217_v56 = vrot.slane %v2534_v10, 2 }
  0x34   :  { %2185 = vmatprep.subr.bf16.mxu0 %v2184_v57  ;;  %2080 = vmatprep.mubr.msk.f32.mxu1 %vm397_vm3, %v369_v4 }
  0x35   :  { %v220_v25 = vsel %vm210_vm4, %v217_v56, %v219_v7 }
  0x37   :  { %2187 = vmatpush3.bf16.msra.mxu0 %v2186_v8  ;;  %2081 = vmatmul.mubr.msk.f32.gmra.mrb[4].mxu1 %vm397_vm3, %v371_v9  ;;  %v218_v8 = vsel %vm210_vm4, %v216_v55, %v217_v56 }
  0x38   :  { %2083 = vmatprep.mubr.msk.f32.mxu1 %vm397_vm3, %v374_v13 }
  0x3b   :  { %2084 = vmatmul.mubr.msk.f32.gmra.mrb[6].mxu1 %vm397_vm3, %v376_v16 }
  0x3c   :  { %2086 = vmatprep.mubr.msk.f32.mxu1 %vm397_vm3, %v379_v23 }
  0x3f   :  { %2087 = vmatmul.mubr.msk.f32.gmra.mrb[8].mxu1 %vm397_vm3, %v381_v27 }
  0x40   :  { %2089 = vmatprep.mubr.msk.f32.mxu1 %vm397_vm3, %v384_v30 }
  0x43   :  { %2090 = vmatmul.mubr.msk.f32.gmra.mrb[10].mxu1 %vm397_vm3, %v386_v33  ;;  %v224_v33 = vrot.slane %v2563_v24, 2 }
  0x44   :  { %2092 = vmatprep.mubr.msk.f32.mxu1 %vm397_vm3, %v389_v37 }
  0x47   :  { %2093 = vmatmul.mubr.msk.f32.gmra.mrb[12].mxu1 %vm397_vm3, %v391_v43 }
  0x48   :  { %2095 = vmatprep.mubr.msk.f32.mxu1 %vm397_vm3, %v394_v46  ;;  %v227_v46 = vrot.slane %v2580_v34, 2 }
  0x4b   :  { %2096 = vmatmul.mubr.msk.f32.gmra.mrb[14].mxu1 %vm397_vm3, %v396_v47 }
  0x79   :  { %v2268_v51 = vpop.permute.xlu0 %2267 }
  0x7a   :  { %v2270_v57 = vunpack.i.h.bf16 %v2268_v51  ;;  %v2269_v58 = vunpack.i.l.bf16 %v2268_v51  ;;  %v228_v51 = vsel %vm210_vm4, %v226_v45, %v227_v46 }
  0x7b   :  { %v2278_v59 = vpop.permute.xlu1 %2277 }
  0x7c   :  { %v414_v61 = vsel %vm397_vm3, %v213_v52, %v2269_v58  ;;  %v398_v3 = vsel %vm397_vm3, %v2508_v0, %v2270_v57  ;;  %v2279_v4 = vunpack.i.l.bf16 %v2278_v59  ;;  %v2280_v13 = vunpack.i.h.bf16 %v2278_v59 }
  0x7d   :  { %v2273_v5 = vpop.permute.xlu0 %2272  ;;  %533 = vmatprep.mubr.f32.mxu0 %v414_v61  ;;  %v229_v52 = vrot.slane %v2589_v39, 2  ;;  %v231_v59 = vrot.slane %v2598_v44, 2  ;;  %v232_v61 = vrot.slane %v2607_v49, 2 }
  0x7e   :  { %v2275_v9 = vunpack.i.h.bf16 %v2273_v5  ;;  %v2274_v11 = vunpack.i.l.bf16 %v2273_v5  ;;  %534 = vmatmul.mubr.f32.vlgmr.msra.gmra.mrb[0].mxu0 %v398_v3  ;;  %v416_v22 = vsel %vm397_vm3, %v218_v8, %v2279_v4  ;;  %v400_v28 = vsel %vm397_vm3, %v2518_v2, %v2280_v13 }
  0x7f   :  { %v2283_v14 = vpop.permute.xlu1 %2282  ;;  %v225_v2 = vsel %vm210_vm4, %v222_v17, %v224_v33  ;;  %v234_v8 = vrot.slane %v2616_v54, 2 }
  0x80   :  { %v415_v15 = vsel %vm397_vm3, %v215_v6, %v2274_v11  ;;  %v399_v16 = vsel %vm397_vm3, %v2513_v1, %v2275_v9  ;;  %v2284_v0 = vunpack.i.l.bf16 %v2283_v14  ;;  %v2285_v27 = vunpack.i.h.bf16 %v2283_v14 }
  0x81   :  { %538 = vmatprep.mubr.f32.mxu0 %v415_v15  ;;  %v2288_v23 = vpop.permute.xlu0 %2287  ;;  %v233_v6 = vsel %vm210_vm4, %v231_v59, %v232_v61  ;;  %v236_v15 = vrot.slane %v2628_v62, 2 }
  0x82   :  { %539 = vmatmul.mubr.f32.gmra.mrb[2].mxu0 %v399_v16  ;;  %v2289_v30 = vunpack.i.l.bf16 %v2288_v23  ;;  %v417_v1 = vsel %vm397_vm3, %v220_v25, %v2284_v0  ;;  %v2290_v36 = vunpack.i.h.bf16 %v2288_v23  ;;  %v401_v37 = vsel %vm397_vm3, %v2534_v10, %v2285_v27 }
  0x83   :  { %543 = vmatprep.mubr.f32.mxu0 %v416_v22  ;;  %v2293_v31 = vpop.permute.xlu1 %2292  ;;  %v237_v16 = vrot.slane %v2633_v63, 2 }
  0x84   :  { %v2294_v38 = vunpack.i.l.bf16 %v2293_v31  ;;  %v418_v42 = vsel %vm397_vm3, %v223_v32, %v2289_v30  ;;  %v2295_v47 = vunpack.i.h.bf16 %v2293_v31  ;;  %v402_v24 = vsel %vm397_vm3, %v2550_v18, %v2290_v36 }
  0x85   :  { %v2298_v43 = vpop.permute.xlu0 %2297  ;;  %v230_v18 = vsel %vm210_vm4, %v227_v46, %v229_v52  ;;  %v238_v25 = vsel %vm210_vm4, %v236_v15, %v237_v16  ;;  %v241_v31 = vrot.slane %v2654_v20, 2  ;;  %v242_v32 = vrot.slane %v2659_v21, 2 }
  0x86   :  { %544 = vmatmul.mubr.f32.gmra.mrb[4].mxu0 %v400_v28  ;;  %v2299_v48 = vunpack.i.l.bf16 %v2298_v43  ;;  %v419_v50 = vsel %vm397_vm3, %v225_v2, %v2294_v38  ;;  %v2300_v53 = vunpack.i.h.bf16 %v2298_v43  ;;  %v403_v55 = vsel %vm397_vm3, %v2555_v19, %v2295_v47 }
  0x87   :  { %548 = vmatprep.mubr.f32.mxu0 %v417_v1  ;;  %v2303_v10 = vpop.permute.xlu1 %2302  ;;  %v243_v38 = vsel %vm210_vm4, %v241_v31, %v242_v32 }
  0x88   :  { %v2304_v56 = vunpack.i.l.bf16 %v2303_v10  ;;  %v420_v57 = vsel %vm397_vm3, %v228_v51, %v2299_v48  ;;  %v2305_v3 = vunpack.i.h.bf16 %v2303_v10  ;;  %v404_v39 = vsel %vm397_vm3, %v2571_v29, %v2300_v53 }
  0x89   :  { %v2308_v58 = vpop.permute.xlu0 %2307  ;;  %v235_v29 = vsel %vm210_vm4, %v232_v61, %v234_v8  ;;  %v247_v48 = vrot.slane %v2687_v41, 2  ;;  %v249_v53 = vrot.slane %v2719_v60, 2  ;;  %v886_v8 = vld [vmem:[%s3599_s3 + $0x130] sm:$0xff] }
  0x8a   :  { %549 = vmatmul.mubr.f32.gmra.mrb[6].mxu0 %v401_v37  ;;  %v2309_v4 = vunpack.i.l.bf16 %v2308_v58  ;;  %v421_v5 = vsel %vm397_vm3, %v230_v18, %v2304_v56  ;;  %v2310_v7 = vunpack.i.h.bf16 %v2308_v58  ;;  %v405_v9 = vsel %vm397_vm3, %v2580_v34, %v2305_v3  ;;  %v881_v3 = vld [vmem:[%s3599_s3 + $0x108] sm:$0xff] }
  0x8b   :  { %553 = vmatprep.mubr.f32.mxu0 %v418_v42  ;;  %v2313_v19 = vpop.permute.xlu1 %2312  ;;  %v244_v42 = vrot.slane %v2674_v35, 2  ;;  %v250_v18 = vsel %vm210_vm4, %v247_v48, %v249_v53 }
  0x8c   :  { %v2314_v11 = vunpack.i.l.bf16 %v2313_v19  ;;  %v422_v13 = vsel %vm397_vm3, %v233_v6, %v2309_v4  ;;  %v2315_v0 = vunpack.i.h.bf16 %v2313_v19  ;;  %v406_v54 = vsel %vm397_vm3, %v2598_v44, %v2310_v7  ;;  %v885_v19 = vld [vmem:[%s3599_s3 + $0x128] sm:$0xff]  ;;  %v887_v7 = vld [vmem:[%s3599_s3 + $0x138] sm:$0xff] }
  0x8d   :  { %v2318_v14 = vpop.permute.xlu0 %2317  ;;  %v240_v44 = vsel %vm210_vm4, %v237_v16, %v239_v26 }
  0x8e   :  { %554 = vmatmul.mubr.f32.gmra.mrb[8].mxu0 %v402_v24  ;;  %v2319_v22 = vunpack.i.l.bf16 %v2318_v14  ;;  %v423_v23 = vsel %vm397_vm3, %v235_v29, %v2314_v11  ;;  %v2320_v17 = vunpack.i.h.bf16 %v2318_v14  ;;  %v407_v27 = vsel %vm397_vm3, %v2607_v49, %v2315_v0 }
  0x8f   :  { %558 = vmatprep.mubr.f32.mxu0 %v419_v50  ;;  %v2323_v34 = vpop.permute.xlu1 %2322  ;;  %v246_v24 = vrot.slane %v2682_v40, 2 }
  0x90   :  { %v2324_v28 = vunpack.i.l.bf16 %v2323_v34  ;;  %v424_v30 = vsel %vm397_vm3, %v238_v25, %v2319_v22  ;;  %v2325_v33 = vunpack.i.h.bf16 %v2323_v34  ;;  %v408_v12 = vsel %vm397_vm3, %v2628_v62, %v2320_v17 }
  0x91   :  { %v2328_v1 = vpop.permute.xlu0 %2327  ;;  %v245_v62 = vsel %vm210_vm4, %v242_v32, %v244_v42  ;;  %v248_v52 = vsel %vm210_vm4, %v246_v24, %v247_v48  ;;  %v849_v32 = vld [vmem:[%s3599_s3 + $0x8] sm:$0xff]  ;;  %v868_v42 = vld [vmem:[%s3599_s3 + $0xa0] sm:$0xff]  ;;  %v871_v24 = vld [vmem:[%s3599_s3 + $0xb8] sm:$0xff] }
  0x92   :  { %559 = vmatmul.mubr.f32.gmra.mrb[10].mxu0 %v403_v55  ;;  %v2329_v36 = vunpack.i.l.bf16 %v2328_v1  ;;  %v425_v37 = vsel %vm397_vm3, %v240_v44, %v2324_v28  ;;  %v2330_v43 = vunpack.i.h.bf16 %v2328_v1  ;;  %v409_v2 = vsel %vm397_vm3, %v2633_v63, %v2325_v33  ;;  %v865_v1 = vld [vmem:[%s3599_s3 + $0x88] sm:$0xff]  ;;  %v848_v44 = vld [vmem:[%s3599_s3] sm:$0xff]  ;;  %v866_v33 = vld [vmem:[%s3599_s3 + $0x90] sm:$0xff] }
  0x93   :  { %563 = vmatprep.mubr.f32.mxu0 %v420_v57  ;;  %v2333_v49 = vpop.permute.xlu1 %2332 }
  0x94   :  { %v2334_v45 = vunpack.i.l.bf16 %v2333_v49  ;;  %v426_v46 = vsel %vm397_vm3, %v243_v38, %v2329_v36  ;;  %v2335_v50 = vunpack.i.h.bf16 %v2333_v49  ;;  %v410_v35 = vsel %vm397_vm3, %v2654_v20, %v2330_v43  ;;  %v850_v49 = vld [vmem:[%s3599_s3 + $0x10] sm:$0xff]  ;;  %v851_v38 = vld [vmem:[%s3599_s3 + $0x18] sm:$0xff]  ;;  %v869_v43 = vld [vmem:[%s3599_s3 + $0xa8] sm:$0xff] }
  0x95   :  { %v2338_v47 = vpop.permute.xlu0 %2337  ;;  %v2206_v36 = vpack.c.bf16 %v849_v32, %v848_v44 }
  0x96   :  { %564 = vmatmul.mubr.f32.gmra.mrb[12].mxu0 %v404_v39  ;;  %v2339_v10 = vunpack.i.l.bf16 %v2338_v47  ;;  %v427_v51 = vsel %vm397_vm3, %v245_v62, %v2334_v45  ;;  %v2340_v55 = vunpack.i.h.bf16 %v2338_v47  ;;  %v411_v56 = vsel %vm397_vm3, %v2659_v21, %v2335_v50  ;;  %v880_v21 = vld [vmem:[%s3599_s3 + $0x100] sm:$0xff]  ;;  %v853_v47 = vld [vmem:[%s3599_s3 + $0x28] sm:$0xff]  ;;  %v870_v62 = vld [vmem:[%s3599_s3 + $0xb0] sm:$0xff] }
  0x97   :  { %568 = vmatprep.mubr.f32.mxu0 %v421_v5  ;;  %v2343_v63 = vpop.permute.xlu1 %2342  ;;  %v2236_v39 = vpack.c.bf16 %v881_v3, %v880_v21  ;;  %v884_v5 = vld [vmem:[%s3599_s3 + $0x120] sm:$0xff]  ;;  %v2212_v45 = vpack.c.bf16 %v869_v43, %v868_v42  ;;  %v2216_v50 = vpack.c.bf16 %v871_v24, %v870_v62  ;;  %v877_v21 = vld [vmem:[%s3599_s3 + $0xe8] sm:$0xff] }
  0x98   :  { %v2344_v57 = vunpack.i.l.bf16 %v2343_v63  ;;  %v428_v58 = vsel %vm397_vm3, %v248_v52, %v2339_v10  ;;  %v2345_v20 = vunpack.i.h.bf16 %v2343_v63  ;;  %v412_v59 = vsel %vm397_vm3, %v2682_v40, %v2340_v55  ;;  %v882_v40 = vld [vmem:[%s3599_s3 + $0x110] sm:$0xff]  ;;  %v855_v10 = vld [vmem:[%s3599_s3 + $0x38] sm:$0xff]  ;;  %v873_v63 = vld [vmem:[%s3599_s3 + $0xc8] sm:$0xff] }
  0x99   :  { %2237 = vmatprep.subr.bf16.mxu0 %v2236_v39  ;;  %v2244_v6 = vpack.c.bf16 %v885_v19, %v884_v5  ;;  %v856_v55 = vld [vmem:[%s3599_s3 + $0x40] sm:$0xff]  ;;  %v879_v5 = vld [vmem:[%s3599_s3 + $0xf8] sm:$0xff] }
  0x9a   :  { %569 = vmatmul.mubr.f32.gmra.mrb[14].mxu0 %v405_v9  ;;  %v429_v61 = vsel %vm397_vm3, %v250_v18, %v2344_v57  ;;  %v413_v60 = vsel %vm397_vm3, %v2687_v41, %v2345_v20  ;;  %v883_v41 = vld [vmem:[%s3599_s3 + $0x118] sm:$0xff]  ;;  %v2248_v9 = vpack.c.bf16 %v887_v7, %v886_v8  ;;  %v874_v57 = vld [vmem:[%s3599_s3 + $0xd0] sm:$0xff] }
  0x9b   :  { %573 = vmatprep.mubr.f32.mxu0 %v422_v13  ;;  %2239 = vmatpush3.bf16.msra.mxu0 %v2236_v39  ;;  %v2240_v4 = vpack.c.bf16 %v883_v41, %v882_v40  ;;  %v860_v40 = vld [vmem:[%s3599_s3 + $0x60] sm:$0xff]  ;;  %v861_v41 = vld [vmem:[%s3599_s3 + $0x68] sm:$0xff] }
  0x9c   :  { %v2230_v19 = vpack.c.bf16 %v861_v41, %v860_v40 }
  0x9d   :  { %2241 = vmatprep.subr.bf16.mxu0 %v2240_v4 }
  0x9e   :  { %574 = vmatmul.mubr.f32.gmra.mrb[16].mxu0 %v406_v54 }
  0x9f   :  { %578 = vmatprep.mubr.f32.mxu0 %v423_v23  ;;  %2243 = vmatpush3.bf16.msra.mxu0 %v2240_v4  ;;  %v878_v4 = vld [vmem:[%s3599_s3 + $0xf0] sm:$0xff] }
  0xa0   :  { %2245 = vmatprep.subr.bf16.mxu0 %v2244_v6 }
  0xa2   :  { %579 = vmatmul.mubr.f32.gmra.mrb[18].mxu0 %v407_v27 }
  0xa3   :  { %583 = vmatprep.mubr.f32.mxu0 %v424_v30  ;;  %2247 = vmatpush3.bf16.msra.mxu0 %v2244_v6  ;;  %v864_v30 = vld [vmem:[%s3599_s3 + $0x80] sm:$0xff]  ;;  %v2232_v6 = vpack.c.bf16 %v879_v5, %v878_v4 }
  0xa4   :  { %2249 = vmatprep.subr.bf16.mxu0 %v2248_v9  ;;  %v2204_v31 = vpack.c.bf16 %v865_v1, %v864_v30 }
  0xa6   :  { %584 = vmatmul.mubr.f32.gmra.mrb[20].mxu0 %v408_v12  ;;  %v867_v12 = vld [vmem:[%s3599_s3 + $0x98] sm:$0xff]  ;;  %2205 = vmatprep.subr.bf16.mxu1 %v2204_v31 }
  0xa7   :  { %588 = vmatprep.mubr.f32.mxu0 %v425_v37  ;;  %2251 = vmatpush3.bf16.msra.mxu0 %v2248_v9  ;;  %v2208_v37 = vpack.c.bf16 %v867_v12, %v866_v33  ;;  %v3134_v9 = vld [vmem:[%s3598_s2] ss:$0 sm:$0xff] }
  0xa8   :  { %2207 = vmatpush3.bf16.msra.mxu1 %v2206_v36 }
  0xa9   :  { %2209 = vmatprep.subr.bf16.mxu1 %v2208_v37 }
  0xaa   :  { %589 = vmatmul.mubr.f32.gmra.mrb[22].mxu0 %v409_v2  ;;  %v2210_v2 = vpack.c.bf16 %v851_v38, %v850_v49 }
  0xab   :  { %593 = vmatprep.mubr.f32.mxu0 %v426_v46  ;;  %v852_v46 = vld [vmem:[%s3599_s3 + $0x20] sm:$0xff] }
  0xac   :  { %2211 = vmatpush3.bf16.msra.mxu1 %v2210_v2  ;;  %v2214_v48 = vpack.c.bf16 %v853_v47, %v852_v46  ;;  %v862_v2 = vld [vmem:[%s3599_s3 + $0x70] sm:$0xff] }
  0xad   :  { %2213 = vmatprep.subr.bf16.mxu1 %v2212_v45  ;;  %v863_v45 = vld [vmem:[%s3599_s3 + $0x78] sm:$0xff] }
  0xae   :  { %594 = vmatmul.mubr.f32.gmra.mrb[24].mxu0 %v410_v35  ;;  %v854_v35 = vld [vmem:[%s3599_s3 + $0x30] sm:$0xff]  ;;  %v2234_v62 = vpack.c.bf16 %v863_v45, %v862_v2 }
  0xaf   :  { %598 = vmatprep.mubr.f32.mxu0 %v427_v51  ;;  %v872_v51 = vld [vmem:[%s3599_s3 + $0xc0] sm:$0xff]  ;;  %v2218_v52 = vpack.c.bf16 %v855_v10, %v854_v35 }
  0xb0   :  { %2215 = vmatpush3.bf16.msra.mxu1 %v2214_v48  ;;  %v2220_v53 = vpack.c.bf16 %v873_v63, %v872_v51 }
  0xb1   :  { %2217 = vmatprep.subr.bf16.mxu1 %v2216_v50 }
  0xb2   :  { %599 = vmatmul.mubr.f32.gmra.mrb[26].mxu0 %v411_v56  ;;  %v857_v56 = vld [vmem:[%s3599_s3 + $0x48] sm:$0xff] }
  0xb3   :  { %603 = vmatprep.mubr.f32.mxu0 %v428_v58  ;;  %v875_v58 = vld [vmem:[%s3599_s3 + $0xd8] sm:$0xff]  ;;  %v2222_v18 = vpack.c.bf16 %v857_v56, %v856_v55  ;;  %v2451_v56 = vmov 0.0  }
  0xb4   :  { %2219 = vmatpush3.bf16.msra.mxu1 %v2218_v52  ;;  %v2224_v20 = vpack.c.bf16 %v875_v58, %v874_v57  ;;  %v3157_v57 = vrot.slane %v2451_v56, 4  ;;  %v3163_v58 = vrot.slane %v2451_v56, 3 }
  0xb5   :  { %2221 = vmatprep.subr.bf16.mxu1 %v2220_v53 }
  0xb6   :  { %604 = vmatmul.mubr.f32.gmra.mrb[28].mxu0 %v412_v59  ;;  %v858_v59 = vld [vmem:[%s3599_s3 + $0x50] sm:$0xff] }
  0xb7   :  { %608 = vmatprep.mubr.f32.mxu0 %v429_v61  ;;  %v859_v61 = vld [vmem:[%s3599_s3 + $0x58] sm:$0xff] }
  0xb8   :  { %2223 = vmatpush3.bf16.msra.mxu1 %v2222_v18  ;;  %v2226_v3 = vpack.c.bf16 %v859_v61, %v858_v59 }
  0xb9   :  { %2225 = vmatprep.subr.bf16.mxu1 %v2224_v20 }
  0xba   :  { %609 = vmatmul.mubr.f32.gmra.mrb[30].mxu0 %v413_v60  ;;  %v876_v60 = vld [vmem:[%s3599_s3 + $0xe0] sm:$0xff] }
  0xbb   :  { %v2228_v39 = vpack.c.bf16 %v877_v21, %v876_v60 }
  0xbc   :  { %2227 = vmatpush3.bf16.msra.mxu1 %v2226_v3 }
  0xbd   :  { %2229 = vmatprep.subr.bf16.mxu1 %v2228_v39 }
  0xc0   :  { %2231 = vmatpush3.bf16.msra.mxu1 %v2230_v19 }
  0xc1   :  { %2233 = vmatprep.subr.bf16.mxu1 %v2232_v6 }
  0xc4   :  { %2235 = vmatpush3.bf16.msra.mxu1 %v2234_v62 }
 0x102   :  { %v3009_v11 = vpop.f32.mrb[0].mxu1 }
 0x103   :  { %v3011_v13 = vpop.f32.mrb[1].mxu1 }
 0x106   :  { %v3013_v14 = vpop.f32.mrb[2].mxu1 }
 0x107   :  { %v3015_v29 = vpop.f32.mrb[3].mxu1 }
 0x10a   :  { %v3017_v15 = vpop.f32.mrb[4].mxu1 }
 0x10b   :  { %v3019_v16 = vpop.f32.mrb[5].mxu1 }
 0x10e   :  { %v3021_v0 = vpop.f32.mrb[6].mxu1 }
 0x10f   :  { %v3023_v54 = vpop.f32.mrb[7].mxu1 }
 0x112   :  { %v3025_v22 = vpop.f32.mrb[8].mxu1 }
 0x113   :  { %v3027_v23 = vpop.f32.mrb[9].mxu1 }
 0x116   :  { %v3029_v34 = vpop.f32.mrb[10].mxu1 }
 0x117   :  { %v3031_v25 = vpop.f32.mrb[11].mxu1 }
 0x11a   :  { %v3033_v26 = vpop.f32.mrb[12].mxu1 }
 0x11b   :  { %v3035_v17 = vpop.f32.mrb[13].mxu1 }
 0x11e   :  { %v3037_v27 = vpop.f32.mrb[14].mxu1 }
 0x11f   :  { %v3039_v28 = vpop.f32.mrb[15].mxu1 }
 0x151   :  { %v1874_v8 = vpop.f32.mrb[0].mxu0 }
 0x152   :  { %v1875_v7 = vpop.f32.mrb[1].mxu0 }
 0x153   :  { %v1876_v30 = vadd.f32 %v1875_v7, %v1874_v8 }
 0x155   :  { %v1877_v1 = vpop.f32.mrb[2].mxu0  ;;  %v536_v44 = vadd.f32 %v1876_v30, %v3134_v9 }
 0x156   :  { %v1878_v31 = vpop.f32.mrb[3].mxu0 }
 0x157   :  { %v1879_v32 = vadd.f32 %v1878_v31, %v1877_v1  ;;  %v681_v33 = vadd.f32 %v3011_v13, %v536_v44 }
 0x159   :  { %v541_v12 = vadd.f32 %v1879_v32, %v3134_v9  ;;  %v759_v36 = vmax.f32 %v681_v33, 0.0  ;;  %v1880_v37 = vpop.f32.mrb[4].mxu0 }
 0x15a   :  { %v1881_v49 = vpop.f32.mrb[5].mxu0 }
 0x15b   :  { %v686_v38 = vadd.f32 %v3009_v11, %v541_v12  ;;  %v1882_v42 = vadd.f32 %v1881_v49, %v1880_v37  ;;  %v792_v43 = vrot.slane %v759_v36, 6 }
 0x15d   :  { %v760_v46 = vmax.f32 %v686_v38, 0.0  ;;  %v1883_v13 = vpop.f32.mrb[6].mxu0  ;;  %v546_v47 = vadd.f32 %v1882_v42, %v3134_v9  ;;  %v3149_v35 = vsel %vm791_vm5, 0.0, %v792_v43 }
 0x15e   :  { %v1884_v24 = vpop.f32.mrb[7].mxu0  ;;  %v1116_v59 = vrot.slane %v3149_v35, 4  ;;  %v905_v39 = vrot.slane %v3149_v35, 1 }
 0x15f   :  { %v793_v48 = vrot.slane %v760_v46, 6  ;;  %v1885_v50 = vadd.f32 %v1884_v24, %v1883_v13  ;;  %v691_v11 = vadd.f32 %v3015_v29, %v546_v47  ;;  %v3160_v29 = vrot.slane %v2451_v56, 1 }
 0x161   :  { %v794_v10 = vsel %vm791_vm5, %v792_v43, %v793_v48  ;;  %v551_v51 = vadd.f32 %v1885_v50, %v3134_v9  ;;  %v761_v63 = vmax.f32 %v691_v11, 0.0  ;;  %v1886_v52 = vpop.f32.mrb[8].mxu0 }
 0x162   :  { %v3154_v53 = vsel %vm356_vm2, %v794_v10, 0.0  ;;  %v1887_v55 = vpop.f32.mrb[9].mxu0 }
 0x163   :  { %v696_v18 = vadd.f32 %v3013_v14, %v551_v51  ;;  %v1888_v20 = vadd.f32 %v1887_v55, %v1886_v52  ;;  %v1117_v61 = vrot.slane %v3154_v53, 4  ;;  %v795_v60 = vrot.slane %v761_v63, 6 }
 0x164   :  { %v906_v21 = vrot.slane %v3154_v53, 1  ;;  %v1036_v3 = vrot.slane %v3154_v53, 3  ;;  %v1035_v14 = vrot.slane %v3149_v35, 3 }
 0x165   :  { %v762_v40 = vmax.f32 %v696_v18, 0.0  ;;  %v1889_v41 = vpop.f32.mrb[10].mxu0  ;;  %v556_v4 = vadd.f32 %v1888_v20, %v3134_v9  ;;  %v1118_v5 = vsel %vm356_vm2, %v1116_v59, %v1117_v61  ;;  %v1120_v6 = vsel %vm356_vm2, %v1117_v61, %v3157_v57 }
 0x166   :  { %v1890_v19 = vpop.f32.mrb[11].mxu0  ;;  %2114 = vmatprep.mubr.msk.f32.mxu0 %vm397_vm3, %v1118_v5  ;;  %v909_v8 = vsel %vm121_vm0, %v906_v21, %v3160_v29  ;;  %v1039_v7 = vsel %vm267_vm1, %v1036_v3, %v3163_v58  ;;  %v907_v30 = vsel %vm121_vm0, %v905_v39, %v906_v21  ;;  %v3185_v33 = vsel %vm791_vm5, 0.0, %v795_v60 }
 0x167   :  { %v796_v1 = vrot.slane %v762_v40, 6  ;;  %v1891_v44 = vadd.f32 %v1890_v19, %v1889_v41  ;;  %v701_v31 = vadd.f32 %v3019_v16, %v556_v4  ;;  %2115 = vmatmul.mubr.msk.f32.vlgmr.msra.gmra.mrb[32].mxu0 %vm397_vm3, %v1120_v6  ;;  %v2351_v32 = vpack.i.bf16 %v909_v8, %v1039_v7 }
 0x168   :  { %v1037_v12 = vsel %vm267_vm1, %v1035_v14, %v1036_v3  ;;  %v1121_v46 = vrot.slane %v3185_v33, 4  ;;  %v910_v48 = vrot.slane %v3185_v33, 1  ;;  %v1040_v51 = vrot.slane %v3185_v33, 3 }
 0x169   :  { %v797_v36 = vsel %vm791_vm5, %v795_v60, %v796_v1  ;;  %v561_v37 = vadd.f32 %v1891_v44, %v3134_v9  ;;  %v763_v49 = vmax.f32 %v701_v31, 0.0  ;;  %2352 = vrot.lane.b32.xlu1 %v2351_v32, %s2450_s29  ;;  %v2346_v38 = vpack.i.bf16 %v907_v30, %v1037_v12  ;;  %v1892_v42 = vpop.f32.mrb[12].mxu0 }
 0x16a   :  { %v3192_v43 = vsel %vm356_vm2, %v797_v36, 0.0  ;;  %v1893_v16 = vpop.f32.mrb[13].mxu0 }
 0x16b   :  { %v706_v2 = vadd.f32 %v3017_v15, %v561_v37  ;;  %2347 = vrot.lane.b32.xlu0 %v2346_v38, %s2450_s29  ;;  %v1894_v45 = vadd.f32 %v1893_v16, %v1892_v42  ;;  %v1122_v13 = vrot.slane %v3192_v43, 4  ;;  %v798_v47 = vrot.slane %v763_v49, 6 }
 0x16c   :  { %v911_v62 = vrot.slane %v3192_v43, 1  ;;  %v1041_v24 = vrot.slane %v3192_v43, 3 }
 0x16d   :  { %v764_v50 = vmax.f32 %v706_v2, 0.0  ;;  %v1895_v11 = vpop.f32.mrb[14].mxu0  ;;  %v566_v10 = vadd.f32 %v1894_v45, %v3134_v9  ;;  %v1123_v15 = vsel %vm356_vm2, %v1121_v46, %v1122_v13  ;;  %v1124_v52 = vsel %vm356_vm2, %v1122_v13, %v3157_v57 }
 0x16e   :  { %v1896_v63 = vpop.f32.mrb[15].mxu0  ;;  %2117 = vmatprep.mubr.msk.f32.mxu0 %vm397_vm3, %v1123_v15  ;;  %v913_v55 = vsel %vm121_vm0, %v911_v62, %v3160_v29  ;;  %v1043_v18 = vsel %vm267_vm1, %v1041_v24, %v3163_v58  ;;  %v912_v20 = vsel %vm121_vm0, %v910_v48, %v911_v62  ;;  %v3215_v3 = vsel %vm791_vm5, 0.0, %v798_v47 }
 0x16f   :  { %v799_v59 = vrot.slane %v764_v50, 6  ;;  %v1897_v61 = vadd.f32 %v1896_v63, %v1895_v11  ;;  %v711_v60 = vadd.f32 %v3023_v54, %v566_v10  ;;  %2118 = vmatmul.mubr.msk.f32.gmra.mrb[34].mxu0 %vm397_vm3, %v1124_v52  ;;  %v2361_v21 = vpack.i.bf16 %v913_v55, %v1043_v18 }
 0x170   :  { %v1042_v39 = vsel %vm267_vm1, %v1040_v51, %v1041_v24  ;;  %v1125_v7 = vrot.slane %v3215_v3, 4  ;;  %v914_v32 = vrot.slane %v3215_v3, 1  ;;  %v1044_v49 = vrot.slane %v3215_v3, 3 }
 0x171   :  { %v800_v40 = vsel %vm791_vm5, %v798_v47, %v799_v59  ;;  %v571_v41 = vadd.f32 %v1897_v61, %v3134_v9  ;;  %v765_v4 = vmax.f32 %v711_v60, 0.0  ;;  %2362 = vrot.lane.b32.xlu1 %v2361_v21, %s2450_s29  ;;  %v2356_v5 = vpack.i.bf16 %v912_v20, %v1042_v39  ;;  %v1898_v14 = vpop.f32.mrb[16].mxu0 }
 0x172   :  { %v3222_v19 = vsel %vm356_vm2, %v800_v40, 0.0  ;;  %v1899_v54 = vpop.f32.mrb[17].mxu0 }
 0x173   :  { %v716_v6 = vadd.f32 %v3021_v0, %v571_v41  ;;  %2357 = vrot.lane.b32.xlu0 %v2356_v5, %s2450_s29  ;;  %v1900_v8 = vadd.f32 %v1899_v54, %v1898_v14  ;;  %v1126_v30 = vrot.slane %v3222_v19, 4  ;;  %v801_v1 = vrot.slane %v765_v4, 6 }
 0x174   :  { %v915_v44 = vrot.slane %v3222_v19, 1  ;;  %v1045_v31 = vrot.slane %v3222_v19, 3 }
 0x175   :  { %v766_v12 = vmax.f32 %v716_v6, 0.0  ;;  %v1901_v36 = vpop.f32.mrb[18].mxu0  ;;  %v576_v37 = vadd.f32 %v1900_v8, %v3134_v9  ;;  %v1127_v0 = vsel %vm356_vm2, %v1125_v7, %v1126_v30  ;;  %v1128_v42 = vsel %vm356_vm2, %v1126_v30, %v3157_v57 }
 0x176   :  { %v1902_v38 = vpop.f32.mrb[19].mxu0  ;;  %2120 = vmatprep.mubr.msk.f32.mxu0 %vm397_vm3, %v1127_v0  ;;  %v917_v16 = vsel %vm121_vm0, %v915_v44, %v3160_v29  ;;  %v1047_v2 = vsel %vm267_vm1, %v1045_v31, %v3163_v58  ;;  %v916_v45 = vsel %vm121_vm0, %v914_v32, %v915_v44  ;;  %v3245_v24 = vsel %vm791_vm5, 0.0, %v801_v1 }
 0x177   :  { %v802_v46 = vrot.slane %v766_v12, 6  ;;  %v1903_v13 = vadd.f32 %v1902_v38, %v1901_v36  ;;  %v721_v47 = vadd.f32 %v3027_v23, %v576_v37  ;;  %2121 = vmatmul.mubr.msk.f32.gmra.mrb[36].mxu0 %vm397_vm3, %v1128_v42  ;;  %v2371_v62 = vpack.i.bf16 %v917_v16, %v1047_v2 }
 0x178   :  { %v1046_v48 = vsel %vm267_vm1, %v1044_v49, %v1045_v31  ;;  %v1129_v18 = vrot.slane %v3245_v24, 4  ;;  %v918_v21 = vrot.slane %v3245_v24, 1  ;;  %v1048_v4 = vrot.slane %v3245_v24, 3 }
 0x179   :  { %v803_v50 = vsel %vm791_vm5, %v801_v1, %v802_v46  ;;  %v581_v11 = vadd.f32 %v1903_v13, %v3134_v9  ;;  %v767_v10 = vmax.f32 %v721_v47, 0.0  ;;  %2372 = vrot.lane.b32.xlu1 %v2371_v62, %s2450_s29  ;;  %v2366_v15 = vpack.i.bf16 %v916_v45, %v1046_v48  ;;  %v1904_v51 = vpop.f32.mrb[20].mxu0 }
 0x17a   :  { %v3252_v63 = vsel %vm356_vm2, %v803_v50, 0.0  ;;  %v1905_v23 = vpop.f32.mrb[21].mxu0 }
 0x17b   :  { %v726_v52 = vadd.f32 %v3025_v22, %v581_v11  ;;  %2367 = vrot.lane.b32.xlu0 %v2366_v15, %s2450_s29  ;;  %v1906_v55 = vadd.f32 %v1905_v23, %v1904_v51  ;;  %v1130_v20 = vrot.slane %v3252_v63, 4  ;;  %v804_v59 = vrot.slane %v767_v10, 6 }
 0x17c   :  { %v919_v61 = vrot.slane %v3252_v63, 1  ;;  %v1049_v60 = vrot.slane %v3252_v63, 3 }
 0x17d   :  { %v768_v39 = vmax.f32 %v726_v52, 0.0  ;;  %v1907_v40 = vpop.f32.mrb[22].mxu0  ;;  %v586_v41 = vadd.f32 %v1906_v55, %v3134_v9  ;;  %v1131_v22 = vsel %vm356_vm2, %v1129_v18, %v1130_v20  ;;  %v1132_v14 = vsel %vm356_vm2, %v1130_v20, %v3157_v57 }
 0x17e   :  { %v1908_v5 = vpop.f32.mrb[23].mxu0  ;;  %2123 = vmatprep.mubr.msk.f32.mxu0 %vm397_vm3, %v1131_v22  ;;  %v921_v54 = vsel %vm121_vm0, %v919_v61, %v3160_v29  ;;  %v1051_v6 = vsel %vm267_vm1, %v1049_v60, %v3163_v58  ;;  %v920_v8 = vsel %vm121_vm0, %v918_v21, %v919_v61  ;;  %v3275_v31 = vsel %vm791_vm5, 0.0, %v804_v59 }
 0x17f   :  { %v805_v7 = vrot.slane %v768_v39, 6  ;;  %v1909_v30 = vadd.f32 %v1908_v5, %v1907_v40  ;;  %v731_v1 = vadd.f32 %v3031_v25, %v586_v41  ;;  %2124 = vmatmul.mubr.msk.f32.gmra.mrb[38].mxu0 %vm397_vm3, %v1132_v14  ;;  %v2381_v44 = vpack.i.bf16 %v921_v54, %v1051_v6 }
 0x180   :  { %v1050_v32 = vsel %vm267_vm1, %v1048_v4, %v1049_v60  ;;  %v1133_v2 = vrot.slane %v3275_v31, 4  ;;  %v922_v62 = vrot.slane %v3275_v31, 1  ;;  %v1052_v10 = vrot.slane %v3275_v31, 3 }
 0x181   :  { %v806_v12 = vsel %vm791_vm5, %v804_v59, %v805_v7  ;;  %v591_v36 = vadd.f32 %v1909_v30, %v3134_v9  ;;  %v769_v37 = vmax.f32 %v731_v1, 0.0  ;;  %2382 = vrot.lane.b32.xlu1 %v2381_v44, %s2450_s29  ;;  %v2376_v0 = vpack.i.bf16 %v920_v8, %v1050_v32  ;;  %v1910_v49 = vpop.f32.mrb[24].mxu0 }
 0x182   :  { %v3282_v38 = vsel %vm356_vm2, %v806_v12, 0.0  ;;  %v1911_v25 = vpop.f32.mrb[25].mxu0 }
 0x183   :  { %v736_v42 = vadd.f32 %v3029_v34, %v591_v36  ;;  %2377 = vrot.lane.b32.xlu0 %v2376_v0, %s2450_s29  ;;  %v1912_v16 = vadd.f32 %v1911_v25, %v1910_v49  ;;  %v1134_v45 = vrot.slane %v3282_v38, 4  ;;  %v807_v46 = vrot.slane %v769_v37, 6 }
 0x184   :  { %v923_v13 = vrot.slane %v3282_v38, 1  ;;  %v1053_v47 = vrot.slane %v3282_v38, 3 }
 0x185   :  { %v770_v48 = vmax.f32 %v736_v42, 0.0  ;;  %v1913_v50 = vpop.f32.mrb[26].mxu0  ;;  %v596_v11 = vadd.f32 %v1912_v16, %v3134_v9  ;;  %v1135_v34 = vsel %vm356_vm2, %v1133_v2, %v1134_v45  ;;  %v1136_v51 = vsel %vm356_vm2, %v1134_v45, %v3157_v57 }
 0x186   :  { %v1914_v15 = vpop.f32.mrb[27].mxu0  ;;  %2126 = vmatprep.mubr.msk.f32.mxu0 %vm397_vm3, %v1135_v34  ;;  %v925_v23 = vsel %vm121_vm0, %v923_v13, %v3160_v29  ;;  %v1055_v52 = vsel %vm267_vm1, %v1053_v47, %v3163_v58  ;;  %v924_v55 = vsel %vm121_vm0, %v922_v62, %v923_v13  ;;  %v3305_v60 = vsel %vm791_vm5, 0.0, %v807_v46 }
 0x187   :  { %v808_v18 = vrot.slane %v770_v48, 6  ;;  %v1915_v20 = vadd.f32 %v1914_v15, %v1913_v50  ;;  %v741_v59 = vadd.f32 %v3035_v17, %v596_v11  ;;  %2127 = vmatmul.mubr.msk.f32.gmra.mrb[40].mxu0 %vm397_vm3, %v1136_v51  ;;  %v2391_v61 = vpack.i.bf16 %v925_v23, %v1055_v52 }
 0x188   :  { %v1054_v21 = vsel %vm267_vm1, %v1052_v10, %v1053_v47  ;;  %v1137_v6 = vrot.slane %v3305_v60, 4  ;;  %v926_v44 = vrot.slane %v3305_v60, 1  ;;  %v1056_v37 = vrot.slane %v3305_v60, 3 }
 0x189   :  { %v809_v39 = vsel %vm791_vm5, %v807_v46, %v808_v18  ;;  %v601_v40 = vadd.f32 %v1915_v20, %v3134_v9  ;;  %v771_v41 = vmax.f32 %v741_v59, 0.0  ;;  %2392 = vrot.lane.b32.xlu1 %v2391_v61, %s2450_s29  ;;  %v2386_v22 = vpack.i.bf16 %v924_v55, %v1054_v21  ;;  %v1916_v4 = vpop.f32.mrb[28].mxu0 }
 0x18a   :  { %v3312_v5 = vsel %vm356_vm2, %v809_v39, 0.0  ;;  %v1917_v17 = vpop.f32.mrb[29].mxu0 }
 0x18b   :  { %v746_v14 = vadd.f32 %v3033_v26, %v601_v40  ;;  %2387 = vrot.lane.b32.xlu0 %v2386_v22, %s2450_s29  ;;  %v1918_v54 = vadd.f32 %v1917_v17, %v1916_v4  ;;  %v1138_v8 = vrot.slane %v3312_v5, 4  ;;  %v810_v7 = vrot.slane %v771_v41, 6 }
 0x18c   :  { %v927_v30 = vrot.slane %v3312_v5, 1  ;;  %v1057_v1 = vrot.slane %v3312_v5, 3 }
 0x18d   :  { %v772_v32 = vmax.f32 %v746_v14, 0.0  ;;  %v1919_v12 = vpop.f32.mrb[30].mxu0  ;;  %v606_v36 = vadd.f32 %v1918_v54, %v3134_v9  ;;  %v1139_v26 = vsel %vm356_vm2, %v1137_v6, %v1138_v8  ;;  %v1140_v49 = vsel %vm356_vm2, %v1138_v8, %v3157_v57 }
 0x18e   :  { %v1920_v0 = vpop.f32.mrb[31].mxu0  ;;  %2129 = vmatprep.mubr.msk.f32.mxu0 %vm397_vm3, %v1139_v26  ;;  %v929_v25 = vsel %vm121_vm0, %v927_v30, %v3160_v29  ;;  %v1059_v42 = vsel %vm267_vm1, %v1057_v1, %v3163_v58  ;;  %v928_v16 = vsel %vm121_vm0, %v926_v44, %v927_v30  ;;  %v3335_v47 = vsel %vm791_vm5, 0.0, %v810_v7 }
 0x18f   :  { %v811_v2 = vrot.slane %v772_v32, 6  ;;  %v1921_v45 = vadd.f32 %v1920_v0, %v1919_v12  ;;  %v751_v46 = vadd.f32 %v3039_v28, %v606_v36  ;;  %2130 = vmatmul.mubr.msk.f32.gmra.mrb[42].mxu0 %vm397_vm3, %v1140_v49  ;;  %v2401_v13 = vpack.i.bf16 %v929_v25, %v1059_v42 }
 0x190   :  { %v1058_v62 = vsel %vm267_vm1, %v1056_v37, %v1057_v1  ;;  %v1141_v15 = vrot.slane %v3335_v47, 4  ;;  %v930_v55 = vrot.slane %v3335_v47, 1  ;;  %v1060_v18 = vrot.slane %v3335_v47, 3 }
 0x191   :  { %v812_v48 = vsel %vm791_vm5, %v810_v7, %v811_v2  ;;  %v611_v50 = vadd.f32 %v1921_v45, %v3134_v9  ;;  %v773_v11 = vmax.f32 %v751_v46, 0.0  ;;  %2402 = vrot.lane.b32.xlu1 %v2401_v13, %s2450_s29  ;;  %v2396_v34 = vpack.i.bf16 %v928_v16, %v1058_v62 }
 0x192   :  { %v3342_v10 = vsel %vm356_vm2, %v812_v48, 0.0  ;;  %v3394_v16 = vrot.slane %v2451_v56, 2 }
 0x193   :  { %v756_v28 = vadd.f32 %v3037_v27, %v611_v50  ;;  %2397 = vrot.lane.b32.xlu0 %v2396_v34, %s2450_s29  ;;  %v1142_v51 = vrot.slane %v3342_v10, 4  ;;  %v931_v23 = vrot.slane %v3342_v10, 1  ;;  %v813_v52 = vrot.slane %v773_v11, 6 }
 0x194   :  { %v1061_v9 = vrot.slane %v3342_v10, 3 }
 0x195   :  { %v774_v20 = vmax.f32 %v756_v28, 0.0  ;;  %v1143_v59 = vsel %vm356_vm2, %v1141_v15, %v1142_v51  ;;  %v1144_v27 = vsel %vm356_vm2, %v1142_v51, %v3157_v57  ;;  %v933_v61 = vsel %vm121_vm0, %v931_v23, %v3160_v29 }
 0x196   :  { %2132 = vmatprep.mubr.msk.f32.mxu0 %vm397_vm3, %v1143_v59  ;;  %v1063_v21 = vsel %vm267_vm1, %v1061_v9, %v3163_v58  ;;  %v932_v39 = vsel %vm121_vm0, %v930_v55, %v931_v23  ;;  %v1062_v40 = vsel %vm267_vm1, %v1060_v18, %v1061_v9  ;;  %v3364_v17 = vsel %vm791_vm5, 0.0, %v813_v52 }
 0x197   :  { %v814_v41 = vrot.slane %v774_v20, 6  ;;  %2133 = vmatmul.mubr.msk.f32.gmra.mrb[44].mxu0 %vm397_vm3, %v1144_v27  ;;  %v2411_v22 = vpack.i.bf16 %v933_v61, %v1063_v21  ;;  %v2406_v4 = vpack.i.bf16 %v932_v39, %v1062_v40  ;;  %v1145_v6 = vrot.slane %v3364_v17, 4 }
 0x198   :  { %v934_v1 = vrot.slane %v3364_v17, 1  ;;  %v1064_v44 = vrot.slane %v3364_v17, 3  ;;  %v992_v15 = vrot.slane %v3192_v43, 2  ;;  %v996_v39 = vrot.slane %v3222_v19, 2 }
 0x199   :  { %v815_v14 = vsel %vm791_vm5, %v813_v52, %v814_v41  ;;  %2412 = vrot.lane.b32.xlu1 %v2411_v22, %s2450_s29  ;;  %2407 = vrot.lane.b32.xlu0 %v2406_v4, %s2450_s29  ;;  %v991_v52 = vrot.slane %v3185_v33, 2  ;;  %v995_v22 = vrot.slane %v3215_v3, 2 }
 0x19a   :  { %v3370_v54 = vsel %vm356_vm2, %v815_v14, 0.0  ;;  %v994_v61 = vsel %vm210_vm4, %v992_v15, %v3394_v16 }
 0x19b   :  { %v1146_v8 = vrot.slane %v3370_v54, 4  ;;  %v935_v7 = vrot.slane %v3370_v54, 1  ;;  %v1065_v30 = vrot.slane %v3370_v54, 3  ;;  %v993_v18 = vsel %vm210_vm4, %v991_v52, %v992_v15 }
 0x19d   :  { %v1147_v32 = vsel %vm356_vm2, %v1145_v6, %v1146_v8  ;;  %v1148_v12 = vsel %vm356_vm2, %v1146_v8, %v3157_v57  ;;  %v937_v36 = vsel %vm121_vm0, %v935_v7, %v3160_v29  ;;  %v1067_v26 = vsel %vm267_vm1, %v1065_v30, %v3163_v58 }
 0x19e   :  { %2135 = vmatprep.mubr.msk.f32.mxu0 %vm397_vm3, %v1147_v32  ;;  %v2421_v37 = vpack.i.bf16 %v937_v36, %v1067_v26  ;;  %v936_v0 = vsel %vm121_vm0, %v934_v1, %v935_v7  ;;  %v1066_v49 = vsel %vm267_vm1, %v1064_v44, %v1065_v30  ;;  %v987_v29 = vrot.slane %v3154_v53, 2 }
 0x19f   :  { %2136 = vmatmul.mubr.msk.f32.gmra.mrb[46].mxu0 %vm397_vm3, %v1148_v12  ;;  %v2416_v25 = vpack.i.bf16 %v936_v0, %v1066_v49  ;;  %v986_v58 = vrot.slane %v3149_v35, 2  ;;  %v997_v6 = vsel %vm210_vm4, %v995_v22, %v996_v39  ;;  %v998_v1 = vsel %vm210_vm4, %v996_v39, %v3394_v16 }
 0x1a0   :  { %2422 = vrot.lane.b32.xlu1 %v2421_v37, %s2450_s29  ;;  %v990_v11 = vsel %vm210_vm4, %v987_v29, %v3394_v16  ;;  %v1000_v32 = vrot.slane %v3252_v63, 2  ;;  %v999_v26 = vrot.slane %v3245_v24, 2  ;;  %vm1715_vm0 = vcmask 130048  }
 0x1a1   :  { %2417 = vrot.lane.b32.xlu0 %v2416_v25, %s2450_s29  ;;  %v988_v13 = vsel %vm210_vm4, %v986_v58, %v987_v29 }
 0x1a2   :  { %v1001_v49 = vsel %vm210_vm4, %v999_v26, %v1000_v32 }
 0x1db   :  { %v2353_v57 = vpop.permute.xlu1 %2352 }
 0x1dc   :  { %v2354_v2 = vunpack.i.l.bf16 %v2353_v57  ;;  %v2355_v50 = vunpack.i.h.bf16 %v2353_v57 }
 0x1dd   :  { %v2348_v42 = vpop.permute.xlu0 %2347 }
 0x1de   :  { %v2350_v45 = vunpack.i.h.bf16 %v2348_v42  ;;  %v2349_v46 = vunpack.i.l.bf16 %v2348_v42  ;;  %v1166_v34 = vsel %vm397_vm3, %v990_v11, %v2354_v2  ;;  %v1150_v23 = vsel %vm397_vm3, %v3154_v53, %v2355_v50 }
 0x1df   :  { %v1002_v42 = vsel %vm210_vm4, %v1000_v32, %v3394_v16  ;;  %v1004_v2 = vrot.slane %v3282_v38, 2  ;;  %v1015_v32 = vrot.slane %v3364_v17, 2 }
 0x1e0   :  { %v1165_v62 = vsel %vm397_vm3, %v988_v13, %v2349_v46  ;;  %v1149_v48 = vsel %vm397_vm3, %v3149_v35, %v2350_v45  ;;  %v1003_v13 = vrot.slane %v3275_v31, 2 }
 0x1e1   :  { %1284 = vmatprep.mubr.f32.mxu1 %v1165_v62  ;;  %v1006_v15 = vsel %vm210_vm4, %v1004_v2, %v3394_v16 }
 0x1e2   :  { %1285 = vmatmul.mubr.f32.vlgmr.msra.gmra.mrb[16].mxu1 %v1149_v48  ;;  %v1005_v50 = vsel %vm210_vm4, %v1003_v13, %v1004_v2 }
 0x1e3   :  { %1289 = vmatprep.mubr.f32.mxu1 %v1166_v34  ;;  %v2363_v28 = vpop.permute.xlu1 %2362 }
 0x1e4   :  { %v2364_v9 = vunpack.i.l.bf16 %v2363_v28  ;;  %v2365_v27 = vunpack.i.h.bf16 %v2363_v28 }
 0x1e5   :  { %v2358_v51 = vpop.permute.xlu0 %2357 }
 0x1e6   :  { %v2360_v35 = vunpack.i.h.bf16 %v2358_v51  ;;  %v2359_v55 = vunpack.i.l.bf16 %v2358_v51  ;;  %1290 = vmatmul.mubr.f32.gmra.mrb[18].mxu1 %v1150_v23  ;;  %v1168_v53 = vsel %vm397_vm3, %v994_v61, %v2364_v9  ;;  %v1152_v41 = vsel %vm397_vm3, %v3192_v43, %v2365_v27 }
 0x1e7   :  { %v1008_v23 = vrot.slane %v3312_v5, 2 }
 0x1e8   :  { %v1167_v20 = vsel %vm397_vm3, %v993_v18, %v2359_v55  ;;  %v1151_v59 = vsel %vm397_vm3, %v3185_v33, %v2360_v35  ;;  %v1007_v35 = vrot.slane %v3305_v60, 2 }
 0x1e9   :  { %1294 = vmatprep.mubr.f32.mxu1 %v1167_v20 }
 0x1ea   :  { %1295 = vmatmul.mubr.f32.gmra.mrb[20].mxu1 %v1151_v59  ;;  %v1009_v20 = vsel %vm210_vm4, %v1007_v35, %v1008_v23  ;;  %v3523_v35 = vld [vmem:[%s3600_s4] ss:$0 sm:$0xff] }
 0x1eb   :  { %1299 = vmatprep.mubr.f32.mxu1 %v1168_v53  ;;  %v2373_v21 = vpop.permute.xlu1 %2372  ;;  %v1010_v53 = vsel %vm210_vm4, %v1008_v23, %v3394_v16  ;;  %v1603_v23 = vld [vmem:[%s3601_s5 + $0x18] sm:$0xff] }
 0x1ec   :  { %v2374_v4 = vunpack.i.l.bf16 %v2373_v21  ;;  %v2375_v30 = vunpack.i.h.bf16 %v2373_v21 }
 0x1ed   :  { %v2368_v40 = vpop.permute.xlu0 %2367 }
 0x1ee   :  { %v2370_v33 = vunpack.i.h.bf16 %v2368_v40  ;;  %v2369_v14 = vunpack.i.l.bf16 %v2368_v40  ;;  %1300 = vmatmul.mubr.f32.gmra.mrb[22].mxu1 %v1152_v41  ;;  %v1170_v43 = vsel %vm397_vm3, %v998_v1, %v2374_v4  ;;  %v1154_v36 = vsel %vm397_vm3, %v3222_v19, %v2375_v30 }
 0x1ef   :  { %v1011_v41 = vrot.slane %v3335_v47, 2  ;;  %v1016_v1 = vrot.slane %v3370_v54, 2 }
 0x1f0   :  { %v1169_v8 = vsel %vm397_vm3, %v997_v6, %v2369_v14  ;;  %v1153_v7 = vsel %vm397_vm3, %v3215_v3, %v2370_v33 }
 0x1f1   :  { %1304 = vmatprep.mubr.f32.mxu1 %v1169_v8 }
 0x1f2   :  { %1305 = vmatmul.mubr.f32.gmra.mrb[24].mxu1 %v1153_v7 }
 0x1f3   :  { %1309 = vmatprep.mubr.f32.mxu1 %v1170_v43  ;;  %v2383_v44 = vpop.permute.xlu1 %2382 }
 0x1f4   :  { %v2384_v37 = vunpack.i.l.bf16 %v2383_v44  ;;  %v2385_v29 = vunpack.i.h.bf16 %v2383_v44 }
 0x1f5   :  { %v2378_v12 = vpop.permute.xlu0 %2377 }
 0x1f6   :  { %v2380_v3 = vunpack.i.h.bf16 %v2378_v12  ;;  %v2379_v0 = vunpack.i.l.bf16 %v2378_v12  ;;  %1310 = vmatmul.mubr.f32.gmra.mrb[26].mxu1 %v1154_v36  ;;  %v1172_v19 = vsel %vm397_vm3, %v1002_v42, %v2384_v37  ;;  %v1156_v46 = vsel %vm397_vm3, %v3252_v63, %v2385_v29 }
 0x1f8   :  { %v1171_v25 = vsel %vm397_vm3, %v1001_v49, %v2379_v0  ;;  %v1155_v57 = vsel %vm397_vm3, %v3245_v24, %v2380_v3 }
 0x1f9   :  { %1314 = vmatprep.mubr.f32.mxu1 %v1171_v25  ;;  %v1018_v25 = vsel %vm210_vm4, %v1016_v1, %v3394_v16 }
 0x1fa   :  { %1315 = vmatmul.mubr.f32.gmra.mrb[28].mxu1 %v1155_v57 }
 0x1fb   :  { %1319 = vmatprep.mubr.f32.mxu1 %v1172_v19  ;;  %v2393_v58 = vpop.permute.xlu1 %2392 }
 0x1fc   :  { %v2394_v62 = vunpack.i.l.bf16 %v2393_v58  ;;  %v2395_v28 = vunpack.i.h.bf16 %v2393_v58 }
 0x1fd   :  { %v2388_v45 = vpop.permute.xlu0 %2387 }
 0x1fe   :  { %v2390_v24 = vunpack.i.h.bf16 %v2388_v45  ;;  %v2389_v48 = vunpack.i.l.bf16 %v2388_v45  ;;  %1320 = vmatmul.mubr.f32.gmra.mrb[30].mxu1 %v1156_v46  ;;  %v1174_v63 = vsel %vm397_vm3, %v1006_v15, %v2394_v62  ;;  %v1158_v9 = vsel %vm397_vm3, %v3282_v38, %v2395_v28 }
 0x1ff   :  { %v1012_v38 = vrot.slane %v3342_v10, 2 }
 0x200   :  { %v1173_v11 = vsel %vm397_vm3, %v1005_v50, %v2389_v48  ;;  %v1157_v34 = vsel %vm397_vm3, %v3275_v31, %v2390_v24  ;;  %v1601_v24 = vld [vmem:[%s3601_s5 + $0x8] sm:$0xff]  ;;  %v2452_v50 = vmov 0.0|0.0  }
 0x201   :  { %1324 = vmatprep.mubr.f32.mxu1 %v1173_v11  ;;  %v1013_v33 = vsel %vm210_vm4, %v1011_v41, %v1012_v38  ;;  %v1014_v30 = vsel %vm210_vm4, %v1012_v38, %v3394_v16  ;;  %2252 = vmatprep.subr.bf16.mxu1 %v2452_v50 }
 0x202   :  { %1325 = vmatmul.mubr.f32.gmra.mrb[32].mxu1 %v1157_v34 }
 0x203   :  { %1329 = vmatprep.mubr.f32.mxu1 %v1174_v63  ;;  %v2403_v51 = vpop.permute.xlu1 %2402 }
 0x204   :  { %v2404_v55 = vunpack.i.l.bf16 %v2403_v51  ;;  %v2405_v61 = vunpack.i.h.bf16 %v2403_v51  ;;  %v1602_v51 = vld [vmem:[%s3601_s5 + $0x10] sm:$0xff] }
 0x205   :  { %v2398_v52 = vpop.permute.xlu0 %2397 }
 0x206   :  { %v2400_v31 = vunpack.i.h.bf16 %v2398_v52  ;;  %v2399_v18 = vunpack.i.l.bf16 %v2398_v52  ;;  %1330 = vmatmul.mubr.f32.gmra.mrb[34].mxu1 %v1158_v9  ;;  %v1176_v21 = vsel %vm397_vm3, %v1010_v53, %v2404_v55  ;;  %v2256_v52 = vpack.c.bf16 %v1603_v23, %v1602_v51 }
 0x208   :  { %v1175_v59 = vsel %vm397_vm3, %v1009_v20, %v2399_v18  ;;  %v1159_v27 = vsel %vm397_vm3, %v3305_v60, %v2400_v31  ;;  %v1160_v60 = vsel %vm397_vm3, %v3312_v5, %v2405_v61 }
 0x209   :  { %1334 = vmatprep.mubr.f32.mxu1 %v1175_v59 }
 0x20a   :  { %1335 = vmatmul.mubr.f32.gmra.mrb[36].mxu1 %v1159_v27 }
 0x20b   :  { %1339 = vmatprep.mubr.f32.mxu1 %v1176_v21  ;;  %v2413_v39 = vpop.permute.xlu1 %2412  ;;  %v2408_v40 = vpop.permute.xlu0 %2407 }
 0x20c   :  { %v2410_v22 = vunpack.i.h.bf16 %v2408_v40  ;;  %v2409_v4 = vunpack.i.l.bf16 %v2408_v40  ;;  %v2414_v14 = vunpack.i.l.bf16 %v2413_v39  ;;  %v2415_v7 = vunpack.i.h.bf16 %v2413_v39 }
 0x20e   :  { %1340 = vmatmul.mubr.f32.gmra.mrb[38].mxu1 %v1160_v60  ;;  %v1177_v6 = vsel %vm397_vm3, %v1013_v33, %v2409_v4  ;;  %v1161_v8 = vsel %vm397_vm3, %v3335_v47, %v2410_v22  ;;  %v1178_v43 = vsel %vm397_vm3, %v1014_v30, %v2414_v14  ;;  %v1162_v26 = vsel %vm397_vm3, %v3342_v10, %v2415_v7 }
 0x20f   :  { %1344 = vmatprep.mubr.f32.mxu1 %v1177_v6  ;;  %v1017_v47 = vsel %vm210_vm4, %v1015_v32, %v1016_v1 }
 0x212   :  { %1345 = vmatmul.mubr.f32.gmra.mrb[40].mxu1 %v1161_v8  ;;  %v2423_v5 = vpop.permute.xlu1 %2422 }
 0x213   :  { %1349 = vmatprep.mubr.f32.mxu1 %v1178_v43  ;;  %v2418_v44 = vpop.permute.xlu0 %2417  ;;  %v2424_v37 = vunpack.i.l.bf16 %v2423_v5  ;;  %v2425_v49 = vunpack.i.h.bf16 %v2423_v5 }
 0x214   :  { %v2420_v12 = vunpack.i.h.bf16 %v2418_v44  ;;  %v2419_v36 = vunpack.i.l.bf16 %v2418_v44 }
 0x215   :  { %v1180_v57 = vsel %vm397_vm3, %v1018_v25, %v2424_v37  ;;  %v1164_v10 = vsel %vm397_vm3, %v3370_v54, %v2425_v49  ;;  %v1600_v54 = vld [vmem:[%s3601_s5] sm:$0xff] }
 0x216   :  { %1350 = vmatmul.mubr.f32.gmra.mrb[42].mxu1 %v1162_v26  ;;  %v1179_v3 = vsel %vm397_vm3, %v1017_v47, %v2419_v36  ;;  %v1163_v0 = vsel %vm397_vm3, %v3364_v17, %v2420_v12  ;;  %v2253_v11 = vpack.c.bf16 %v1601_v24, %v1600_v54 }
 0x217   :  { %1354 = vmatprep.mubr.f32.mxu1 %v1179_v3 }
 0x218   :  { %2254 = vmatpush3.bf16.msra.mxu1 %v2253_v11 }
 0x219   :  { %2255 = vmatprep.subr.bf16.mxu1 %v2452_v50 }
 0x21a   :  { %1355 = vmatmul.mubr.f32.gmra.mrb[44].mxu1 %v1163_v0 }
 0x21b   :  { %1359 = vmatprep.mubr.f32.mxu1 %v1180_v57 }
 0x21c   :  { %2257 = vmatpush3.bf16.msra.mxu1 %v2256_v52 }
 0x21d   :  { %2258 = vmatprep.subr.bf16.mxu1 %v2452_v50 }
 0x21e   :  { %1360 = vmatmul.mubr.f32.gmra.mrb[46].mxu1 %v1164_v10 }
 0x21f   :  { %2146 = vmatprep.mubr.msk.f32.mxu1 %vm2453_vm6, %v2451_v56 }
 0x23a   :  { %v2116_v29 = vpop.f32.mrb[32].mxu0 }
 0x23b   :  { %v1431_v42 = vpop.f32.mrb[33].mxu0 }
 0x242   :  { %v2119_v19 = vpop.f32.mrb[34].mxu0 }
 0x243   :  { %v1441_v58 = vpop.f32.mrb[35].mxu0 }
 0x24a   :  { %v3482_v2 = vpop.f32.mrb[36].mxu0 }
 0x24b   :  { %v3484_v45 = vpop.f32.mrb[37].mxu0 }
 0x252   :  { %v3486_v17 = vpop.f32.mrb[38].mxu0 }
 0x253   :  { %v3488_v46 = vpop.f32.mrb[39].mxu0 }
 0x25a   :  { %v3490_v16 = vpop.f32.mrb[40].mxu0 }
 0x25b   :  { %v3492_v13 = vpop.f32.mrb[41].mxu0 }
 0x262   :  { %v3494_v62 = vpop.f32.mrb[42].mxu0 }
 0x263   :  { %v3502_v48 = vpop.f32.mrb[43].mxu0 }
 0x26a   :  { %v3504_v34 = vpop.f32.mrb[44].mxu0 }
 0x26b   :  { %v3506_v28 = vpop.f32.mrb[45].mxu0 }
 0x272   :  { %v3508_v15 = vpop.f32.mrb[46].mxu0 }
 0x273   :  { %v3510_v63 = vpop.f32.mrb[47].mxu0 }
 0x2b5   :  { %v1978_v9 = vpop.f32.mrb[16].mxu1 }
 0x2b6   :  { %v1979_v55 = vpop.f32.mrb[17].mxu1 }
 0x2b7   :  { %v1980_v31 = vadd.f32 %v1979_v55, %v1978_v9 }
 0x2b9   :  { %v1287_v18 = vadd.f32 %v1980_v31, %v3523_v35  ;;  %v1981_v20 = vpop.f32.mrb[18].mxu1 }
 0x2ba   :  { %v1982_v59 = vpop.f32.mrb[19].mxu1 }
 0x2bb   :  { %v1432_v27 = vadd.f32 %v1431_v42, %v1287_v18  ;;  %v1983_v61 = vadd.f32 %v1982_v59, %v1981_v20 }
 0x2bd   :  { %v1292_v53 = vadd.f32 %v1983_v61, %v3523_v35  ;;  %v1984_v38 = vpop.f32.mrb[20].mxu1  ;;  %v1510_v39 = vmax.f32 %v1432_v27, 0.0 }
 0x2be   :  { %v1985_v21 = vpop.f32.mrb[21].mxu1 }
 0x2bf   :  { %v1437_v40 = vadd.f32 %v2116_v29, %v1292_v53  ;;  %v1986_v41 = vadd.f32 %v1985_v21, %v1984_v38  ;;  %v1527_v14 = vsel %vm1526_vm7, %v1510_v39, -inf }
 0x2c1   :  { %v1511_v22 = vmax.f32 %v1437_v40, 0.0  ;;  %v1297_v4 = vadd.f32 %v1986_v41, %v3523_v35  ;;  %v1987_v60 = vpop.f32.mrb[22].mxu1 }
 0x2c2   :  { %v1988_v33 = vpop.f32.mrb[23].mxu1 }
 0x2c3   :  { %v1529_v6 = vsel %vm1528_vm8, %v1511_v22, -inf  ;;  %v1442_v8 = vadd.f32 %v1441_v58, %v1297_v4  ;;  %v1989_v7 = vadd.f32 %v1988_v33, %v1987_v60 }
 0x2c4   :  { %v1530_v30 = vmax.f32 %v1527_v14, %v1529_v6 }
 0x2c5   :  { %v1302_v1 = vadd.f32 %v1989_v7, %v3523_v35  ;;  %v1990_v43 = vpop.f32.mrb[24].mxu1  ;;  %v1512_v32 = vmax.f32 %v1442_v8, 0.0 }
 0x2c6   :  { %v1531_v5 = vrot.slane %v1530_v30, 4  ;;  %v1991_v44 = vpop.f32.mrb[25].mxu1 }
 0x2c7   :  { %v1447_v12 = vadd.f32 %v2119_v19, %v1302_v1  ;;  %v1992_v36 = vadd.f32 %v1991_v44, %v1990_v43  ;;  %v1537_v49 = vsel %vm1526_vm7, %v1512_v32, -inf }
 0x2c8   :  { %v1532_v26 = vmax.f32 %v1530_v30, %v1531_v5 }
 0x2c9   :  { %v1513_v47 = vmax.f32 %v1447_v12, 0.0  ;;  %v1307_v37 = vadd.f32 %v1992_v36, %v3523_v35  ;;  %v1993_v3 = vpop.f32.mrb[26].mxu1 }
 0x2ca   :  { %v1994_v0 = vpop.f32.mrb[27].mxu1  ;;  %v1533_v29 = vrot.slane %v1532_v26, 2 }
 0x2cb   :  { %v1538_v25 = vsel %vm1528_vm8, %v1513_v47, -inf  ;;  %v1452_v57 = vadd.f32 %v3484_v45, %v1307_v37  ;;  %v1995_v10 = vadd.f32 %v1994_v0, %v1993_v3 }
 0x2cc   :  { %v1539_v42 = vmax.f32 %v1537_v49, %v1538_v25  ;;  %v1534_v23 = vmax.f32 %v1532_v26, %v1533_v29 }
 0x2cd   :  { %v1312_v58 = vadd.f32 %v1995_v10, %v3523_v35  ;;  %v1996_v54 = vpop.f32.mrb[28].mxu1  ;;  %v1514_v50 = vmax.f32 %v1452_v57, 0.0 }
 0x2ce   :  { %v1540_v19 = vrot.slane %v1539_v42, 4  ;;  %v1997_v24 = vpop.f32.mrb[29].mxu1  ;;  %v1535_v53 = vrot.slane %v1534_v23, 1 }
 0x2cf   :  { %v1457_v11 = vadd.f32 %v3482_v2, %v1312_v58  ;;  %v1998_v51 = vadd.f32 %v1997_v24, %v1996_v54  ;;  %v1546_v20 = vsel %vm1526_vm7, %v1514_v50, -inf }
 0x2d0   :  { %v1541_v52 = vmax.f32 %v1539_v42, %v1540_v19  ;;  %v1536_v14 = vmax.f32 %v1534_v23, %v1535_v53 }
 0x2d1   :  { %v1515_v9 = vmax.f32 %v1457_v11, 0.0  ;;  %v1317_v55 = vadd.f32 %v1998_v51, %v3523_v35  ;;  %v1999_v31 = vpop.f32.mrb[30].mxu1 }
 0x2d2   :  { %v1542_v18 = vrot.slane %v1541_v52, 2  ;;  %v2000_v45 = vpop.f32.mrb[31].mxu1 }
 0x2d3   :  { %v1547_v59 = vsel %vm1528_vm8, %v1515_v9, -inf  ;;  %v1462_v27 = vadd.f32 %v3488_v46, %v1317_v55  ;;  %v2001_v61 = vadd.f32 %v2000_v45, %v1999_v31 }
 0x2d4   :  { %v1543_v38 = vmax.f32 %v1541_v52, %v1542_v18  ;;  %v1548_v21 = vmax.f32 %v1546_v20, %v1547_v59 }
 0x2d5   :  { %v1322_v2 = vadd.f32 %v2001_v61, %v3523_v35  ;;  %v2002_v39 = vpop.f32.mrb[32].mxu1  ;;  %v1516_v4 = vmax.f32 %v1462_v27, 0.0 }
 0x2d6   :  { %v1544_v40 = vrot.slane %v1543_v38, 1  ;;  %v1549_v41 = vrot.slane %v1548_v21, 4  ;;  %v2003_v22 = vpop.f32.mrb[33].mxu1 }
 0x2d7   :  { %v1467_v60 = vadd.f32 %v3486_v17, %v1322_v2  ;;  %v2004_v33 = vadd.f32 %v2003_v22, %v2002_v39  ;;  %v1555_v44 = vsel %vm1526_vm7, %v1516_v4, -inf }
 0x2d8   :  { %v1545_v6 = vmax.f32 %v1543_v38, %v1544_v40  ;;  %v1550_v8 = vmax.f32 %v1548_v21, %v1549_v41 }
 0x2d9   :  { %v1517_v7 = vmax.f32 %v1467_v60, 0.0  ;;  %v1327_v46 = vadd.f32 %v2004_v33, %v3523_v35  ;;  %v2005_v30 = vpop.f32.mrb[34].mxu1 }
 0x2da   :  { %v1620_v1 = vsel %vm1619_vm9, %v1545_v6, %v1536_v14  ;;  %v1551_v43 = vrot.slane %v1550_v8, 2  ;;  %v2006_v5 = vpop.f32.mrb[35].mxu1 }
 0x2db   :  { %v1556_v32 = vsel %vm1528_vm8, %v1517_v7, -inf  ;;  %v1472_v12 = vadd.f32 %v3492_v13, %v1327_v46  ;;  %v2007_v36 = vadd.f32 %v2006_v5, %v2005_v30 }
 0x2dc   :  { %v1552_v26 = vmax.f32 %v1550_v8, %v1551_v43  ;;  %v1557_v17 = vmax.f32 %v1555_v44, %v1556_v32 }
 0x2dd   :  { %v1332_v47 = vadd.f32 %v2007_v36, %v3523_v35  ;;  %v2008_v37 = vpop.f32.mrb[36].mxu1  ;;  %v1518_v25 = vmax.f32 %v1472_v12, 0.0 }
 0x2de   :  { %v1553_v3 = vrot.slane %v1552_v26, 1  ;;  %v1558_v0 = vrot.slane %v1557_v17, 4  ;;  %v2009_v49 = vpop.f32.mrb[37].mxu1 }
 0x2df   :  { %v1477_v57 = vadd.f32 %v3490_v16, %v1332_v47  ;;  %v2010_v10 = vadd.f32 %v2009_v49, %v2008_v37  ;;  %v1564_v11 = vsel %vm1526_vm7, %v1518_v25, -inf }
 0x2e0   :  { %v1554_v29 = vmax.f32 %v1552_v26, %v1553_v3  ;;  %v1559_v42 = vmax.f32 %v1557_v17, %v1558_v0 }
 0x2e1   :  { %v1519_v58 = vmax.f32 %v1477_v57, 0.0  ;;  %v1337_v54 = vadd.f32 %v2010_v10, %v3523_v35  ;;  %v2011_v13 = vpop.f32.mrb[38].mxu1 }
 0x2e2   :  { %v1622_v19 = vsel %vm1621_vm10, %v1554_v29, %v1620_v1  ;;  %v1560_v24 = vrot.slane %v1559_v42, 2  ;;  %v2012_v50 = vpop.f32.mrb[39].mxu1 }
 0x2e3   :  { %v1565_v51 = vsel %vm1528_vm8, %v1519_v58, -inf  ;;  %v1482_v23 = vadd.f32 %v3502_v48, %v1337_v54  ;;  %v2013_v52 = vadd.f32 %v2012_v50, %v2011_v13 }
 0x2e4   :  { %v1561_v9 = vmax.f32 %v1559_v42, %v1560_v24  ;;  %v1566_v55 = vmax.f32 %v1564_v11, %v1565_v51 }
 0x2e5   :  { %v1342_v16 = vadd.f32 %v2013_v52, %v3523_v35  ;;  %v2014_v31 = vpop.f32.mrb[40].mxu1  ;;  %v1520_v59 = vmax.f32 %v1482_v23, 0.0 }
 0x2e6   :  { %v1562_v18 = vrot.slane %v1561_v9, 1  ;;  %v1567_v45 = vrot.slane %v1566_v55, 4  ;;  %v2015_v20 = vpop.f32.mrb[41].mxu1 }
 0x2e7   :  { %v1487_v27 = vadd.f32 %v3494_v62, %v1342_v16  ;;  %v2016_v61 = vadd.f32 %v2015_v20, %v2014_v31  ;;  %v1573_v22 = vsel %vm1526_vm7, %v1520_v59, -inf  ;;  %v1706_v59 = vld [vmem:[%s3603_s7] sm:$0xff] }
 0x2e8   :  { %v1563_v53 = vmax.f32 %v1561_v9, %v1562_v18  ;;  %v1568_v38 = vmax.f32 %v1566_v55, %v1567_v45 }
 0x2e9   :  { %v1521_v21 = vmax.f32 %v1487_v27, 0.0  ;;  %v1347_v2 = vadd.f32 %v2016_v61, %v3523_v35  ;;  %v2017_v48 = vpop.f32.mrb[42].mxu1  ;;  %v1707_v27 = vld [vmem:[%s3603_s7 + $0x8] sm:$0xff]  ;;  %s2426_s7 = scalar_lea.vmem %s1797_s20, 128 }
 0x2ea   :  { %v1569_v39 = vrot.slane %v1568_v38, 2  ;;  %v2018_v40 = vpop.f32.mrb[43].mxu1  ;;  %v1624_v41 = vsel %vm1623_vm11, %v1563_v53, %v1622_v19  ;;  %v2259_v61 = vpack.c.bf16 %v1707_v27, %v1706_v59  ;;  %v1838_v53 = vld [vmem:[%s3602_s6] ss:$0 sm:$0xff]  ;;  %p2427_p0 = scmp.ne.s32.totalorder %s1797_s20, %s2426_s7  ;;  %p2432_p2 = scmp.lt.s32.totalorder %s2426_s7, %s2426_s7 }
 0x2eb   :  { %v1574_v4 = vsel %vm1528_vm8, %v1521_v21, -inf  ;;  %v1492_v60 = vadd.f32 %v3506_v28, %v1347_v2  ;;  %v2019_v33 = vadd.f32 %v2018_v40, %v2017_v48 }
 0x2ec   :  { %v1570_v14 = vmax.f32 %v1568_v38, %v1569_v39  ;;  %v1575_v62 = vmax.f32 %v1573_v22, %v1574_v4  ;;  %p2433_p3 = por %p2432_p2, %p2431_p1 }
 0x2ed   :  { %v1352_v6 = vadd.f32 %v2019_v33, %v3523_v35  ;;  %v2020_v8 = vpop.f32.mrb[44].mxu1  ;;  %v1522_v1 = vmax.f32 %v1492_v60, 0.0 }
 0x2ee   :  { %v1571_v7 = vrot.slane %v1570_v14, 1  ;;  %v1576_v46 = vrot.slane %v1575_v62, 4  ;;  %v2021_v30 = vpop.f32.mrb[45].mxu1  ;;  %p2434_p4 = pnand %p2433_p3, %p2427_p0 }
 0x2ef   :  { %v1497_v43 = vadd.f32 %v3504_v34, %v1352_v6  ;;  %v2022_v5 = vadd.f32 %v2021_v30, %v2020_v8  ;;  %v1582_v37 = vsel %vm1526_vm7, %v1522_v1, -inf }
 0x2f0   :  { %v1572_v44 = vmax.f32 %v1570_v14, %v1571_v7  ;;  %v1577_v32 = vmax.f32 %v1575_v62, %v1576_v46 }
 0x2f1   :  { %v1523_v12 = vmax.f32 %v1497_v43, 0.0  ;;  %v1357_v36 = vadd.f32 %v2022_v5, %v3523_v35  ;;  %v2023_v28 = vpop.f32.mrb[46].mxu1 }
 0x2f2   :  { %v1578_v26 = vrot.slane %v1577_v32, 2  ;;  %v2024_v17 = vpop.f32.mrb[47].mxu1  ;;  %v1626_v47 = vsel %vm1625_vm12, %v1572_v44, %v1624_v41 }
 0x2f3   :  { %v1583_v3 = vsel %vm1528_vm8, %v1523_v12, -inf  ;;  %v1502_v0 = vadd.f32 %v3510_v63, %v1357_v36  ;;  %v2025_v49 = vadd.f32 %v2024_v17, %v2023_v28 }
 0x2f4   :  { %v1579_v25 = vmax.f32 %v1577_v32, %v1578_v26  ;;  %v1584_v34 = vmax.f32 %v1582_v37, %v1583_v3 }
 0x2f5   :  { %v1362_v57 = vadd.f32 %v2025_v49, %v3523_v35  ;;  %v1524_v42 = vmax.f32 %v1502_v0, 0.0 }
 0x2f6   :  { %v1580_v10 = vrot.slane %v1579_v25, 1  ;;  %v1585_v29 = vrot.slane %v1584_v34, 4 }
 0x2f7   :  { %v1507_v58 = vadd.f32 %v3508_v15, %v1362_v57  ;;  %v1591_v11 = vsel %vm1526_vm7, %v1524_v42, -inf }
 0x2f8   :  { %v1581_v54 = vmax.f32 %v1579_v25, %v1580_v10  ;;  %v1586_v13 = vmax.f32 %v1584_v34, %v1585_v29 }
 0x2f9   :  { %v1525_v19 = vmax.f32 %v1507_v58, 0.0 }
 0x2fa   :  { %v1587_v24 = vrot.slane %v1586_v13, 2  ;;  %v1628_v50 = vsel %vm1627_vm13, %v1581_v54, %v1626_v47 }
 0x2fb   :  { %v1592_v63 = vsel %vm1528_vm8, %v1525_v19, -inf }
 0x2fc   :  { %v1588_v51 = vmax.f32 %v1586_v13, %v1587_v24  ;;  %v1593_v23 = vmax.f32 %v1591_v11, %v1592_v63 }
 0x2fe   :  { %v1589_v52 = vrot.slane %v1588_v51, 1  ;;  %v1594_v9 = vrot.slane %v1593_v23, 4 }
 0x300   :  { %v1590_v35 = vmax.f32 %v1588_v51, %v1589_v52  ;;  %v1595_v55 = vmax.f32 %v1593_v23, %v1594_v9 }
 0x302   :  { %v1596_v16 = vrot.slane %v1595_v55, 2  ;;  %v1630_v31 = vsel %vm1629_vm14, %v1590_v35, %v1628_v50 }
 0x304   :  { %v1597_v15 = vmax.f32 %v1595_v55, %v1596_v16 }
 0x306   :  { %v1598_v18 = vrot.slane %v1597_v15, 1 }
 0x308   :  { %v1599_v45 = vmax.f32 %v1597_v15, %v1598_v18 }
 0x30a   :  { %v1632_v20 = vsel %vm1631_vm15, %v1599_v45, %v1630_v31 }
 0x30b   :  { %2147 = vmatmul.mubr.msk.f32.vlgmr.msra.gmra.mrb[48].mxu1 %vm1526_vm7, %v1632_v20 }
 0x30c   :  { %2153 = vmatprep.mubr.msk.f32.mxu1 %vm2453_vm6, %v2451_v56  ;;  %2260 = vmatpush3.bf16.msra.mxu1 %v2259_v61  ;;  %v1840_v56 = vld [vmem:[%s3604_s8] ss:$0 sm:$0xff] }
 0x3de   :  { %v1701_v38 = vpop.f32.mrb[48].mxu1 }
 0x3df   :  { %v1702_v21 = vadd.f32 %v1838_v53, %v1701_v38  ;;  %v2148_v2 = vpop.f32.mrb[49].mxu1 }
 0x3e1   :  { %v1705_v48 = vmax.f32 %v1702_v21, 0.0 }
 0x3e3   :  { %2154 = vmatmul.mubr.msk.f32.vlgmr.msra.gmra.mrb[50].mxu1 %vm1715_vm0, %v1705_v48 }
 0x4b6   :  { %v1785_v39 = vpop.f32.mrb[50].mxu1 }
 0x4b7   :  { %v1786_v40 = vadd.f32 %v1840_v56, %v1785_v39  ;;  %v2155_v41 = vpop.f32.mrb[51].mxu1 }
 0x4b9   :  { %1789 = vst [vmem:[#allocation2] sm:$0xff] %v1786_v40 }
 0x4ba   :  { %2437 = shalt.err (!%p2434_p4)
}
 0x4bb   :  { %s2438_s22 = scalar_lea.hbm %s3605_s9, 128 }
 0x4bc   :  { %p2439_p5 = scmp.ne.s32.totalorder %s3605_s9, %s2438_s22  ;;  %p2442_p6 = scmp.lt.u32.totalorder %s2438_s22, %s3605_s9 }
 0x4be   :  { %p2444_p7 = pnand %p2442_p6, %p2439_p5 }
 0x4c0   :  { %2447 = shalt.err (!%p2444_p7)
}
 0x4c1   :  { %1799 = dma.vmem_to_hbm [thread:$0]  %s1797_s20, 128, %s3605_s9, [#allocation3]  }
 0x4c2   :  { %2448 = dma.done.wait [#allocation3], 128  }
 0x4c3   :  { %2449 = vsyncadd [#allocation3], 4294967168 }
 0x4c4   :  { %1803 = vsyncpa [#allocation3], 1 }

</bundles_post_ra>
